<compile_context>
chip_gen: v5e
topology: v5e:2x2
jax: 0.10.0
libtpu: 0.0.40
codegen_flags: <defaults>
</compile_context>

<pallas_src>
import jax
import jax.numpy as jnp
from jax.experimental import pallas as pl
from jax.experimental.pallas import tpu as pltpu


def _downsample_kernel(x_ref, s_ref, o_ref):
    """x_ref: (K, SB, G*4*Wo)   slab rows = G stride-2 row-pairs [even;odd] each
       s_ref: (G*4*Wo, G*Wo)    block-diagonal 0/1 column/row selector
       o_ref: (K, 2, SB, G*Wo)  axis 1 = [real half, zero half] of the output
    """
    sel = s_ref[...]                                   # resident, loaded once
    zeros = jnp.zeros(o_ref.shape[2:], o_ref.dtype)    # hoisted out of the loop
    for i in range(o_ref.shape[0]):                    # K <= 16, static unroll
        res = jnp.dot(
            x_ref[i], sel,
            precision=jax.lax.Precision.HIGHEST,       # exact 0/1 selection (f32)
            preferred_element_type=jnp.float32,
        )
        o_ref[i, 0] = res.astype(o_ref.dtype)          # real (subsampled) half
        o_ref[i, 1] = zeros                            # x.mul(0) half


def _ceil_to(a, m):
    return -(-a // m) * m


def _divisors(n):
    return [d for d in range(1, n + 1) if n % d == 0]


def resnet_downsample(x, stride=2):
    assert stride == 2
    if not jnp.issubdtype(x.dtype, jnp.floating):
        # TODO(synk): integer inputs need a slice-based column subsample
        # (no integer MXU path on v7x).
        raise NotImplementedError("resnet_downsample: floating dtypes only")

    N, C, H, W = x.shape
    Ho = (H - 1) // 2 + 1            # AvgPool2d(kernel=1, stride=2) output size
    Wo = (W - 1) // 2 + 1
    itemsize = jnp.dtype(x.dtype).itemsize

    # Pad H, W up to even; padded rows/cols are odd-indexed -> never sampled.
    pad_h, pad_w = 2 * Ho - H, 2 * Wo - W
    if pad_h or pad_w:
        x = jnp.pad(x, ((0, 0), (0, 0), (0, pad_h), (0, pad_w)))

    # ---- lane grouping: G consecutive (c, i) output rows per slab row --------
    P = C * Ho                        # real output rows per image (= zero rows)
    if Wo >= 128:
        G = 1
    else:
        cands = [d for d in _divisors(P) if d * Wo >= 128]
        nice = [d for d in cands if (d * Wo) % 128 == 0 and d * Wo <= 512]
        if nice:
            G = min(nice)             # lane-dense and bounded contraction
        elif cands:
            G = min(cands)
        else:
            G = P                     # tiny image: best achievable lane width
    S = P // G                        # slab rows per image
    Lin = G * 4 * Wo                  # G row-pairs of 2*(2*Wo) lanes each
    Lout = G * Wo

    # Free (row-major) reshapes:
    #   input : (N, C, 2Ho, 2Wo) -> (N, S, Lin)
    #   output: (N, 2C, Ho, Wo)  == (N, 2, S, Lout)   (axis 1 = [real, zeros])
    xf = x.reshape(N, S, Lin)

    # Block-diagonal 0/1 selector: sel[p, q] = 1  iff
    #   p == (q // Wo) * 4*Wo + 2 * (q % Wo)    (even column of the even row)
    p_idx = jax.lax.broadcasted_iota(jnp.int32, (Lin, Lout), 0)
    q_idx = jax.lax.broadcasted_iota(jnp.int32, (Lin, Lout), 1)
    sel = (p_idx == (q_idx // Wo) * (4 * Wo) + 2 * (q_idx % Wo)).astype(x.dtype)

    # ---- generation-aware block sizing ---------------------------------------
    try:
        vmem_cap = int(pltpu.get_tpu_info().vmem_capacity_bytes)
    except Exception:
        vmem_cap = 64 * 1024 * 1024                   # v7x-safe fallback
    vmem_limit = int(min(vmem_cap * 5 // 8, 100 * 1024 * 1024))  # ~80MiB v5e/v6e, ~40MiB v7x
    budget = int(vmem_limit * 0.7)

    lout_pad = _ceil_to(Lout, 128)

    def step_bytes(k, sb):
        inp = k * sb * Lin * itemsize                 # input block
        outp = k * 2 * sb * lout_pad * itemsize       # output block (lane-padded)
        sel_b = Lin * lout_pad * itemsize             # resident selector
        acc = k * sb * lout_pad * 4                   # f32 matmul intermediates
        return 2 * (inp + outp) + 2 * sel_b + acc     # x2 for double-buffering

    sb_cands = sorted({d for d in _divisors(S) if d % 8 == 0 or d == S},
                      reverse=True)                   # keep 2nd-minor 8-aligned
    k_cands = sorted([d for d in _divisors(N) if d <= 16], reverse=True)
    feasible = [(k * sb, sb, k) for sb in sb_cands for k in k_cands
                if step_bytes(k, sb) <= budget]
    if feasible:
        _, SB, K = max(feasible)                      # biggest block that fits
    else:
        SB, K = min(sb_cands), 1

    flops = 2 * N * S * Lin * Lout
    bytes_accessed = (N * S * Lin + Lin * Lout + N * 2 * S * Lout) * itemsize

    out_flat = pl.pallas_call(
        _downsample_kernel,
        out_shape=jax.ShapeDtypeStruct((N, 2, S, Lout), x.dtype),
        grid=(N // K, S // SB),
        in_specs=[
            pl.BlockSpec((K, SB, Lin), lambda m, t: (m, t, 0)),
            pl.BlockSpec((Lin, Lout), lambda m, t: (0, 0)),   # resident selector
        ],
        out_specs=pl.BlockSpec((K, 2, SB, Lout), lambda m, t: (m, 0, t, 0)),
        compiler_params=pltpu.CompilerParams(
            dimension_semantics=("parallel", "parallel"),
            vmem_limit_bytes=vmem_limit,
        ),
        cost_estimate=pl.CostEstimate(
            flops=flops, transcendentals=0, bytes_accessed=bytes_accessed),
    )(xf, sel)

    # Free reshape back to NCHW: (N, 2, S, G*Wo) -> (N, 2C, Ho, Wo).
    return out_flat.reshape(N, 2 * C, Ho, Wo)


if __name__ == "__main__":
    key = jax.random.PRNGKey(0)
    x = jax.random.normal(key, (2, 4, 16, 16), dtype=jnp.float32)

    out = jax.block_until_ready(resnet_downsample(x, stride=2))

    # Reference semantics: cat((x[:, :, ::2, ::2], zeros), dim=1)
    sub = x[:, :, ::2, ::2]
    ref = jnp.concatenate([sub, jnp.zeros_like(sub)], axis=1)

    assert out.shape == ref.shape, (out.shape, ref.shape)
    assert jnp.allclose(out, ref, atol=1e-6), "mismatch vs reference"
    print("KERNEL_OK")
</pallas_src>

<mosaic_0001>
module attributes {stable_mosaic.version = 11 : i64} {
  func.func @_downsample_kernel(%arg0: i32, %arg1: i32, %arg2: memref<2x2x512xf32, #tpu.memory_space<vmem>>, %arg3: memref<512x128xf32, #tpu.memory_space<vmem>>, %arg4: memref<2x2x2x128xf32, #tpu.memory_space<vmem>>) attributes {dimension_semantics = [#tpu.dimension_semantics<parallel>, #tpu.dimension_semantics<parallel>], iteration_bounds = array<i64: 1, 1>, scalar_prefetch = 0 : i64, scratch_operands = 0 : i64, tpu.core_type = #tpu.core_type<tc>, window_params = [{transform_indices = @transform_0, window_bounds = array<i64: 2, 2, 512>}, {pipeline_mode = #tpu.pipeline_mode<synchronous>, transform_indices = @transform_1, window_bounds = array<i64: 512, 128>}, {transform_indices = @transform_2, window_bounds = array<i64: 2, 2, 2, 128>}]} {
    %c0 = arith.constant 0 : index
    %c0_0 = arith.constant 0 : index
    %0 = vector.load %arg3[%c0, %c0_0] : memref<512x128xf32, #tpu.memory_space<vmem>>, vector<512x128xf32>
    %cst = arith.constant 0.000000e+00 : f32
    %1 = vector.broadcast %cst : f32 to vector<2x128xf32>
    %c0_1 = arith.constant 0 : index
    %c0_2 = arith.constant 0 : index
    %c0_3 = arith.constant 0 : index
    %2 = vector.load %arg2[%c0_1, %c0_2, %c0_3] : memref<2x2x512xf32, #tpu.memory_space<vmem>>, vector<1x2x512xf32>
    %3 = vector.shape_cast %2 : vector<1x2x512xf32> to vector<2x512xf32>
    %cst_4 = arith.constant dense<0.000000e+00> : vector<2x128xf32>
    %4 = tpu.matmul %3, %0, %cst_4 {dimension_numbers = #tpu.dot_dimension_numbers<[1], [0], [0], [1], [0, 0, 1, 1], [], []>, precision = #tpu.contract_precision<fp32>} : vector<2x512xf32>, vector<512x128xf32>, vector<2x128xf32> -> vector<2x128xf32>
    %c0_5 = arith.constant 0 : index
    %c0_6 = arith.constant 0 : index
    %c0_7 = arith.constant 0 : index
    %c0_8 = arith.constant 0 : index
    %5 = vector.load %arg4[%c0_5, %c0_6, %c0_7, %c0_8] : memref<2x2x2x128xf32, #tpu.memory_space<vmem>>, vector<1x1x2x128xf32>
    %6 = vector.shape_cast %5 : vector<1x1x2x128xf32> to vector<2x128xf32>
    %7 = vector.shape_cast %4 : vector<2x128xf32> to vector<1x1x2x128xf32>
    tpu.vector_store %arg4[%c0_5, %c0_6, %c0_7, %c0_8], %7 {strides = array<i32>} : memref<2x2x2x128xf32, #tpu.memory_space<vmem>>, vector<1x1x2x128xf32>,
    %c0_9 = arith.constant 0 : index
    %c1 = arith.constant 1 : index
    %c0_10 = arith.constant 0 : index
    %c0_11 = arith.constant 0 : index
    %8 = vector.load %arg4[%c0_9, %c1, %c0_10, %c0_11] : memref<2x2x2x128xf32, #tpu.memory_space<vmem>>, vector<1x1x2x128xf32>
    %9 = vector.shape_cast %8 : vector<1x1x2x128xf32> to vector<2x128xf32>
    %10 = vector.shape_cast %1 : vector<2x128xf32> to vector<1x1x2x128xf32>
    tpu.vector_store %arg4[%c0_9, %c1, %c0_10, %c0_11], %10 {strides = array<i32>} : memref<2x2x2x128xf32, #tpu.memory_space<vmem>>, vector<1x1x2x128xf32>,
    %c1_12 = arith.constant 1 : index
    %c0_13 = arith.constant 0 : index
    %c0_14 = arith.constant 0 : index
    %11 = vector.load %arg2[%c1_12, %c0_13, %c0_14] : memref<2x2x512xf32, #tpu.memory_space<vmem>>, vector<1x2x512xf32>
    %12 = vector.shape_cast %11 : vector<1x2x512xf32> to vector<2x512xf32>
    %cst_15 = arith.constant dense<0.000000e+00> : vector<2x128xf32>
    %13 = tpu.matmul %12, %0, %cst_15 {dimension_numbers = #tpu.dot_dimension_numbers<[1], [0], [0], [1], [0, 0, 1, 1], [], []>, precision = #tpu.contract_precision<fp32>} : vector<2x512xf32>, vector<512x128xf32>, vector<2x128xf32> -> vector<2x128xf32>
    %c1_16 = arith.constant 1 : index
    %c0_17 = arith.constant 0 : index
    %c0_18 = arith.constant 0 : index
    %c0_19 = arith.constant 0 : index
    %14 = vector.load %arg4[%c1_16, %c0_17, %c0_18, %c0_19] : memref<2x2x2x128xf32, #tpu.memory_space<vmem>>, vector<1x1x2x128xf32>
    %15 = vector.shape_cast %14 : vector<1x1x2x128xf32> to vector<2x128xf32>
    %16 = vector.shape_cast %13 : vector<2x128xf32> to vector<1x1x2x128xf32>
    tpu.vector_store %arg4[%c1_16, %c0_17, %c0_18, %c0_19], %16 {strides = array<i32>} : memref<2x2x2x128xf32, #tpu.memory_space<vmem>>, vector<1x1x2x128xf32>,
    %c1_20 = arith.constant 1 : index
    %c1_21 = arith.constant 1 : index
    %c0_22 = arith.constant 0 : index
    %c0_23 = arith.constant 0 : index
    %17 = vector.load %arg4[%c1_20, %c1_21, %c0_22, %c0_23] : memref<2x2x2x128xf32, #tpu.memory_space<vmem>>, vector<1x1x2x128xf32>
    %18 = vector.shape_cast %17 : vector<1x1x2x128xf32> to vector<2x128xf32>
    %19 = vector.shape_cast %1 : vector<2x128xf32> to vector<1x1x2x128xf32>
    tpu.vector_store %arg4[%c1_20, %c1_21, %c0_22, %c0_23], %19 {strides = array<i32>} : memref<2x2x2x128xf32, #tpu.memory_space<vmem>>, vector<1x1x2x128xf32>,
    return
  }
  func.func @transform_0(%arg0: i32, %arg1: i32) -> (i32, i32, i32) {
    %c0_i32 = arith.constant 0 : i32
    %c0_i32_0 = arith.constant 0 : i32
    return %arg0, %arg1, %c0_i32 : i32, i32, i32
  }
  func.func @transform_1(%arg0: i32, %arg1: i32) -> (i32, i32) {
    %c0_i32 = arith.constant 0 : i32
    %c0_i32_0 = arith.constant 0 : i32
    %c0_i32_1 = arith.constant 0 : i32
    return %c0_i32, %c0_i32_0 : i32, i32
  }
  func.func @transform_2(%arg0: i32, %arg1: i32) -> (i32, i32, i32, i32) {
    %c0_i32 = arith.constant 0 : i32
    %c0_i32_0 = arith.constant 0 : i32
    %c0_i32_1 = arith.constant 0 : i32
    return %arg0, %c0_i32, %arg1, %c0_i32_0 : i32, i32, i32, i32
  }
}

</mosaic_0001>

<bundles_post_ra>
// kernel: tpu_custom_call.1
= control target key start
LH: loop header
LB: loop body
LE: loop exit
PB: predicated region body
PF: predicated region fallthrough
CT: control target
= control target key end

     0   :  { %7 = vsyncpa [#allocation3], 0  ;;  %s4647_s0 = inlined_call_operand.hbm [shape: f32[2,2,512], index: 0, kind: input, shape index: {}]   ;;  %s4648_s1 = inlined_call_operand.hbm [shape: f32[512,128], index: 1, kind: input, shape index: {}]   ;;  %s4649_s2 = inlined_call_operand.hbm [shape: f32[2,2,2,128], index: 2, kind: output, shape index: {}]  }
   0x1   :  { %8 = vsyncpa [#allocation6], 0 }
   0x2   :  { %9 = vsyncpa [#allocation4], 0  ;;  %s14_s11 = sshll.u32 %s4647_s0, 4  ;;  %s2972_s12 = smov [#allocation2]   ;;  %s15_s11 = int_to_ptr.hbm [resolvable:$true] %s14_s11 }
   0x3   :  { %s16_s13 = sshll.u32 %s2972_s12, 4  ;;  %s27_s16 = sshll.u32 %s4648_s1, 4  ;;  %s17_s13 = int_to_ptr.vmem [resolvable:$true] %s16_s13  ;;  %s28_s16 = int_to_ptr.hbm [resolvable:$true] %s27_s16 }
   0x4   :  { %s2973_s17 = smov 128   ;;  %s2974_s18 = smov 8  }
   0x5   :  { %22 = dma.hbm_to_vmem [thread:$0]  %s15_s11, 256, %s17_s13, [#allocation3], %s2973_s17, %s2973_s17, %s2974_s18  }
   0x6   :  { %s2975_s19 = smov [#allocation5]  }
   0x7   :  { %s29_s20 = sshll.u32 %s2975_s19, 4  ;;  %s30_s20 = int_to_ptr.vmem [resolvable:$true] %s29_s20 }
   0x8   :  { %35 = dma.hbm_to_vmem [thread:$0]  %s28_s16, 8192, %s30_s20, [#allocation6], %s2973_s17, %s2973_s17, %s2974_s18  }
   0x9   :  { %2966 = dma.done.wait [#allocation3], 256  }
   0xa   :  { %2967 = vsyncadd [#allocation3], 4294967040 }
   0xb   :  { %2968 = dma.done.wait [#allocation6], 8192  }
   0xc   :  { %2969 = vsyncadd [#allocation6], 4294959104  ;;  %v59_v0 = vld [vmem:[#allocation5 + $0x78] sm:$0xff]  ;;  %v58_v1 = vld [vmem:[#allocation5 + $0x70] sm:$0xff]  ;;  %s2977_s0 = smov [#allocation7]   ;;  %s2872_s23 = sshll.u32 %s4649_s2, 4  ;;  %s2873_s23 = int_to_ptr.hbm [resolvable:$true] %s2872_s23 }
   0xd   :  { %v57_v2 = vld [vmem:[#allocation5 + $0x68] sm:$0xff]  ;;  %v3001_v3 = vand.u32 4294901760, %v59_v0  ;;  %v3003_v4 = vand.u32 4294901760, %v58_v1  ;;  %v56_v6 = vld [vmem:[#allocation5 + $0x60] sm:$0xff]  ;;  %v55_v7 = vld [vmem:[#allocation5 + $0x58] sm:$0xff]  ;;  %s2870_s1 = sshll.u32 %s2977_s0, 4  ;;  %s2871_s1 = int_to_ptr.vmem [resolvable:$true] %s2870_s1 }
   0xe   :  { %v3005_v5 = vand.u32 4294901760, %v57_v2  ;;  %v54_v8 = vld [vmem:[#allocation5 + $0x50] sm:$0xff]  ;;  %v3007_v9 = vand.u32 4294901760, %v56_v6  ;;  %v3009_v10 = vand.u32 4294901760, %v55_v7  ;;  %v53_v12 = vld [vmem:[#allocation5 + $0x48] sm:$0xff]  ;;  %v52_v13 = vld [vmem:[#allocation5 + $0x40] sm:$0xff] }
   0xf   :  { %4934 = vst [vmem:[#allocation11_spill] sm:$0xff] %v3001_v3  ;;  %v3011_v11 = vand.u32 4294901760, %v54_v8  ;;  %120 = vmatpush.msra.mxu0 %v3001_v3  ;;  %v3015_v14 = vsub.f32 %v59_v0, %v3001_v3  ;;  %v3018_v15 = vsub.f32 %v58_v1, %v3003_v4  ;;  %316 = vmatpush.msra.mxu3 %v3001_v3  ;;  %v3024_v17 = vand.u32 4294901760, %v53_v12  ;;  %v51_v18 = vld [vmem:[#allocation5 + $0x38] sm:$0xff]  ;;  %v50_v26 = vld [vmem:[#allocation5 + $0x30] sm:$0xff]  ;;  %v49_v34 = vld [vmem:[#allocation5 + $0x28] sm:$0xff] }
  0x10   :  { %4935 = vst [vmem:[#allocation12_spill] sm:$0xff] %v3003_v4  ;;  %v3022_v16 = vsub.f32 %v57_v2, %v3005_v5  ;;  %v3027_v19 = vsub.f32 %v56_v6, %v3007_v9  ;;  %v3030_v20 = vsub.f32 %v55_v7, %v3009_v10  ;;  %v3046_v25 = vand.u32 4294901760, %v52_v13  ;;  %v48_v42 = vld [vmem:[#allocation5 + $0x20] sm:$0xff]  ;;  %v47_v48 = vld [vmem:[#allocation5 + $0x18] sm:$0xff]  ;;  %v46_v54 = vld [vmem:[#allocation5 + $0x10] sm:$0xff]  ;;  %s2978_s24 = smov 32  }
  0x11   :  { %4936 = vst [vmem:[#allocation13_spill] sm:$0xff] %v3005_v5  ;;  %v3033_v21 = vsub.f32 %v54_v8, %v3011_v11  ;;  %122 = vmatpush.msra.mxu0 %v3003_v4  ;;  %263 = vmatpush.msra.mxu2 %v3015_v14  ;;  %v3038_v22 = vand.u32 4294901760, %v3015_v14  ;;  %v3041_v23 = vand.u32 4294901760, %v3018_v15  ;;  %v3052_v28 = vand.u32 4294901760, %v51_v18  ;;  %v108_v55 = vld [vmem:[#allocation2] sm:$0xff]  ;;  %v75_v60 = vld [vmem:[#allocation5 + $0xf8] sm:$0xff] }
  0x12   :  { %4937 = vst [vmem:[#allocation14_spill] sm:$0xff] %v3007_v9  ;;  %v3044_v24 = vand.u32 4294901760, %v3022_v16  ;;  %318 = vmatpush.msra.mxu3 %v3003_v4  ;;  %v3050_v27 = vand.u32 4294901760, %v3027_v19  ;;  %v3055_v29 = vsub.f32 %v53_v12, %v3024_v17  ;;  %v3066_v33 = vand.u32 4294901760, %v3030_v20  ;;  %v45_v62 = vld [vmem:[#allocation5 + $0x8] sm:$0xff]  ;;  %v44_v6 = vld [vmem:[#allocation5] sm:$0xff] }
  0x13   :  { %4938 = vst [vmem:[#allocation15_spill] sm:$0xff] %v3009_v10  ;;  %124 = vmatpush.msra.mxu0 %v3005_v5  ;;  %266 = vmatpush.msra.mxu2 %v3018_v15  ;;  %v163_v30 = vsub.f32 %v3015_v14, %v3038_v22  ;;  %v169_v31 = vsub.f32 %v3018_v15, %v3041_v23  ;;  %v3069_v35 = vand.u32 4294901760, %v50_v26  ;;  %v3072_v36 = vand.u32 4294901760, %v3033_v21  ;;  %v74_v7 = vld [vmem:[#allocation5 + $0xf0] sm:$0xff]  ;;  %s2979_s25 = smov 2  }
  0x14   :  { %4939 = vst [vmem:[#allocation16_spill] sm:$0xff] %v3011_v11  ;;  %v175_v32 = vsub.f32 %v3022_v16, %v3044_v24  ;;  %320 = vmatpush.msra.mxu3 %v3005_v5  ;;  %v181_v39 = vsub.f32 %v3027_v19, %v3050_v27  ;;  %v3083_v40 = vsub.f32 %v52_v13, %v3046_v25  ;;  %v3086_v41 = vand.u32 4294901760, %v49_v34 }
  0x15   :  { %4940 = vst [vmem:[#allocation17_spill] sm:$0xff] %v3015_v14  ;;  %126 = vmatpush.msra.mxu0 %v3007_v9  ;;  %v3075_v37 = vand.u32 4294901760, %v163_v30  ;;  %269 = vmatpush.msra.mxu2 %v3022_v16  ;;  %v3078_v38 = vand.u32 4294901760, %v169_v31  ;;  %v187_v44 = vsub.f32 %v3030_v20, %v3066_v33  ;;  %v3095_v45 = vand.u32 4294901760, %v3055_v29 }
  0x16   :  { %4941 = vst [vmem:[#allocation18_spill] sm:$0xff] %v3018_v15  ;;  %322 = vmatpush.msra.mxu3 %v3007_v9  ;;  %v3090_v43 = vand.u32 4294901760, %v175_v32  ;;  %v3098_v46 = vsub.f32 %v51_v18, %v3052_v28  ;;  %v193_v47 = vsub.f32 %v3033_v21, %v3072_v36  ;;  %v3106_v49 = vand.u32 4294901760, %v181_v39 }
  0x17   :  { %4942 = vst [vmem:[#allocation19_spill] sm:$0xff] %v3022_v16  ;;  %128 = vmatpush.msra.mxu0 %v3009_v10  ;;  %165 = vmatpush.msra.mxu1 %v3075_v37  ;;  %v3108_v50 = vand.u32 4294901760, %v48_v42  ;;  %v3111_v51 = vand.u32 4294901760, %v3083_v40  ;;  %v3114_v52 = vsub.f32 %v50_v26, %v3069_v35  ;;  %v3119_v53 = vsub.f32 %v49_v34, %v3086_v41  ;;  %v73_v34 = vld [vmem:[#allocation5 + $0xe8] sm:$0xff] }
  0x18   :  { %4943 = vst [vmem:[#allocation20_spill] sm:$0xff] %v3024_v17  ;;  %272 = vmatpush.msra.mxu2 %v3027_v19  ;;  %324 = vmatpush.msra.mxu3 %v3009_v10  ;;  %v3123_v56 = vand.u32 4294901760, %v187_v44  ;;  %v199_v57 = vsub.f32 %v3055_v29, %v3095_v45  ;;  %v3127_v58 = vand.u32 4294901760, %v47_v48  ;;  %v3130_v59 = vand.u32 4294901760, %v3098_v46 }
  0x19   :  { %4944 = vst [vmem:[#allocation21_spill] sm:$0xff] %v3027_v19  ;;  %130 = vmatpush.msra.mxu0 %v3011_v11  ;;  %171 = vmatpush.msra.mxu1 %v3078_v38  ;;  %v3133_v61 = vand.u32 4294901760, %v193_v47  ;;  %v205_v63 = vsub.f32 %v3083_v40, %v3111_v51  ;;  %v3140_v0 = vand.u32 4294901760, %v46_v54  ;;  %v3143_v1 = vand.u32 4294901760, %v3114_v52 }
  0x1a   :  { %4945 = vst [vmem:[#allocation22_spill] sm:$0xff] %v3030_v20  ;;  %275 = vmatpush.msra.mxu2 %v3030_v20  ;;  %326 = vmatpush.msra.mxu3 %v3011_v11  ;;  %v3146_v2 = vsub.f32 %v48_v42, %v3108_v50  ;;  %v3151_v8 = vand.u32 4294901760, %v3119_v53  ;;  %v3153_v12 = vand.u32 4294901760, %v75_v60  ;;  %v3157_v13 = vand.u32 4294901760, %v199_v57  ;;  %v72_v57 = vld [vmem:[#allocation5 + $0xe0] sm:$0xff] }
  0x1b   :  { %4946 = vst [vmem:[#allocation23_spill] sm:$0xff] %v3033_v21  ;;  %132 = vmatpush.msra.mxu0 %v3024_v17  ;;  %177 = vmatpush.msra.mxu1 %v3090_v43  ;;  %v211_v18 = vsub.f32 %v3098_v46, %v3130_v59  ;;  %v3161_v26 = vand.u32 4294901760, %v45_v62  ;;  %v3164_v30 = vsub.f32 %v47_v48, %v3127_v58  ;;  %v3168_v31 = vand.u32 4294901760, %v44_v6 }
  0x1c   :  { %4947 = vst [vmem:[#allocation24_spill] sm:$0xff] %v3038_v22  ;;  %278 = vmatpush.msra.mxu2 %v3033_v21  ;;  %328 = vmatpush.msra.mxu3 %v3024_v17  ;;  %v3170_v32 = vand.u32 4294901760, %v74_v7  ;;  %v3174_v39 = vand.u32 4294901760, %v205_v63  ;;  %v217_v42 = vsub.f32 %v3114_v52, %v3143_v1  ;;  %v3179_v44 = vand.u32 4294901760, %v3146_v2 }
  0x1d   :  { %4948 = vst [vmem:[#allocation25_spill] sm:$0xff] %v3041_v23  ;;  %134 = vmatpush.msra.mxu0 %v3046_v25  ;;  %183 = vmatpush.msra.mxu1 %v3106_v49  ;;  %v3182_v47 = vsub.f32 %v46_v54, %v3140_v0  ;;  %v223_v48 = vsub.f32 %v3119_v53, %v3151_v8  ;;  %v3193_v63 = vand.u32 4294901760, %v211_v18  ;;  %v3196_v54 = vand.u32 4294901760, %v3164_v30  ;;  %v71_v18 = vld [vmem:[#allocation5 + $0xd8] sm:$0xff] }
  0x1e   :  { %4949 = vst [vmem:[#allocation26_spill] sm:$0xff] %v3044_v24  ;;  %281 = vmatpush.msra.mxu2 %v3055_v29  ;;  %330 = vmatpush.msra.mxu3 %v3046_v25 }
  0x1f   :  { %4950 = vst [vmem:[#allocation27_spill] sm:$0xff] %v3046_v25  ;;  %136 = vmatpush.msra.mxu0 %v3052_v28  ;;  %189 = vmatpush.msra.mxu1 %v3123_v56 }
  0x20   :  { %4951 = vst [vmem:[#allocation28_spill] sm:$0xff] %v3050_v27  ;;  %284 = vmatpush.msra.mxu2 %v3083_v40  ;;  %332 = vmatpush.msra.mxu3 %v3052_v28 }
  0x21   :  { %4952 = vst [vmem:[#allocation29_spill] sm:$0xff] %v3052_v28  ;;  %138 = vmatpush.msra.mxu0 %v3069_v35  ;;  %195 = vmatpush.msra.mxu1 %v3133_v61 }
  0x22   :  { %4953 = vst [vmem:[#allocation30_spill] sm:$0xff] %v3055_v29  ;;  %287 = vmatpush.msra.mxu2 %v3098_v46  ;;  %334 = vmatpush.msra.mxu3 %v3069_v35 }
  0x23   :  { %4954 = vst [vmem:[#allocation31_spill] sm:$0xff] %v3066_v33  ;;  %140 = vmatpush.msra.mxu0 %v3086_v41  ;;  %201 = vmatpush.msra.mxu1 %v3157_v13 }
  0x24   :  { %4955 = vst [vmem:[#allocation32_spill] sm:$0xff] %v3069_v35  ;;  %290 = vmatpush.msra.mxu2 %v3114_v52  ;;  %336 = vmatpush.msra.mxu3 %v3086_v41 }
  0x25   :  { %4956 = vst [vmem:[#allocation33_spill] sm:$0xff] %v3072_v36  ;;  %142 = vmatpush.msra.mxu0 %v3108_v50  ;;  %207 = vmatpush.msra.mxu1 %v3174_v39 }
  0x26   :  { %4957 = vst [vmem:[#allocation34_spill] sm:$0xff] %v3075_v37  ;;  %293 = vmatpush.msra.mxu2 %v3119_v53  ;;  %338 = vmatpush.msra.mxu3 %v3108_v50 }
  0x27   :  { %4958 = vst [vmem:[#allocation35_spill] sm:$0xff] %v3078_v38  ;;  %144 = vmatpush.msra.mxu0 %v3127_v58  ;;  %213 = vmatpush.msra.mxu1 %v3193_v63  ;;  %v68_v38 = vld [vmem:[#allocation5 + $0xc0] sm:$0xff] }
  0x28   :  { %4959 = vst [vmem:[#allocation36_spill] sm:$0xff] %v3083_v40  ;;  %v3209_v40 = vsub.f32 %v74_v7, %v3170_v32  ;;  %296 = vmatpush.msra.mxu2 %v3146_v2  ;;  %340 = vmatpush.msra.mxu3 %v3127_v58  ;;  %v3282_v15 = vand.u32 4294901760, %v68_v38 }
  0x29   :  { %4960 = vst [vmem:[#allocation37_spill] sm:$0xff] %v3086_v41  ;;  %146 = vmatpush.msra.mxu0 %v3140_v0 }
  0x2a   :  { %4961 = vst [vmem:[#allocation38_spill] sm:$0xff] %v3090_v43  ;;  %299 = vmatpush.msra.mxu2 %v3164_v30  ;;  %342 = vmatpush.msra.mxu3 %v3140_v0 }
  0x2b   :  { %4962 = vst [vmem:[#allocation39_spill] sm:$0xff] %v3095_v45  ;;  %148 = vmatpush.msra.mxu0 %v3161_v26 }
  0x2c   :  { %4963 = vst [vmem:[#allocation40_spill] sm:$0xff] %v3098_v46  ;;  %v3199_v46 = vsub.f32 %v45_v62, %v3161_v26  ;;  %v229_v62 = vsub.f32 %v3146_v2, %v3179_v44  ;;  %302 = vmatpush.msra.mxu2 %v3182_v47  ;;  %344 = vmatpush.msra.mxu3 %v3161_v26 }
  0x2d   :  { %4964 = vst [vmem:[#allocation41_spill] sm:$0xff] %v3106_v49  ;;  %v69_v49 = vld [vmem:[#allocation5 + $0xc8] sm:$0xff]  ;;  %150 = vmatpush.msra.mxu0 %v3168_v31 }
  0x2e   :  { %4965 = vst [vmem:[#allocation42_spill] sm:$0xff] %v3108_v50  ;;  %v3234_v29 = vand.u32 4294901760, %v3199_v46  ;;  %v3251_v43 = vand.u32 4294901760, %v229_v62  ;;  %v3264_v37 = vand.u32 4294901760, %v69_v49  ;;  %305 = vmatpush.msra.mxu2 %v3199_v46  ;;  %346 = vmatpush.msra.mxu3 %v3168_v31 }
  0x2f   :  { %4966 = vst [vmem:[#allocation43_spill] sm:$0xff] %v3111_v51  ;;  %357 = vmatpush.msrb.mxu0 %v3038_v22 }
  0x30   :  { %4967 = vst [vmem:[#allocation44_spill] sm:$0xff] %v3114_v52  ;;  %v3218_v52 = vand.u32 4294901760, %v3182_v47 }
  0x31   :  { %4968 = vst [vmem:[#allocation45_spill] sm:$0xff] %v3119_v53  ;;  %361 = vmatpush.msrb.mxu0 %v3041_v23 }
  0x32   :  { %4969 = vst [vmem:[#allocation46_spill] sm:$0xff] %v3123_v56  ;;  %v3220_v56 = vand.u32 4294901760, %v72_v57 }
  0x33   :  { %4970 = vst [vmem:[#allocation47_spill] sm:$0xff] %v3127_v58  ;;  %365 = vmatpush.msrb.mxu0 %v3044_v24 }
  0x34   :  { %4971 = vst [vmem:[#allocation48_spill] sm:$0xff] %v3130_v59  ;;  %v3256_v20 = vsub.f32 %v72_v57, %v3220_v56  ;;  %v247_v57 = vsub.f32 %v3199_v46, %v3234_v29 }
  0x35   :  { %110 = vst [vmem:[#allocation1] ss:$4 sm:$0xff] %v108_v55  ;;  %v3189_v55 = vsub.f32 %v75_v60, %v3153_v12  ;;  %v3206_v60 = vsub.f32 %v44_v6, %v3168_v31  ;;  %v3223_v6 = vand.u32 4294901760, %v223_v48  ;;  %v3239_v48 = vand.u32 4294901760, %v71_v18  ;;  %369 = vmatpush.msrb.mxu0 %v3050_v27 }
  0x36   :  { %4972 = vst [vmem:[#allocation49_spill] sm:$0xff] %v3133_v61  ;;  %v3201_v61 = vand.u32 4294901760, %v73_v34  ;;  %v3291_v14 = vand.u32 4294901760, %v3256_v20 }
  0x37   :  { %4973 = vst [vmem:[#allocation50_spill] sm:$0xff] %v3140_v0  ;;  %v3227_v7 = vand.u32 4294901760, %v3189_v55  ;;  %v3244_v21 = vand.u32 4294901760, %v3206_v60  ;;  %308 = vmatpush.msra.mxu2 %v3206_v60  ;;  %373 = vmatpush.msrb.mxu0 %v3066_v33 }
  0x38   :  { %4974 = vst [vmem:[#allocation51_spill] sm:$0xff] %v3143_v1  ;;  %v3237_v53 = vsub.f32 %v73_v34, %v3201_v61  ;;  %v241_v34 = vsub.f32 %v3182_v47, %v3218_v52 }
  0x39   :  { %4975 = vst [vmem:[#allocation52_spill] sm:$0xff] %v3146_v2  ;;  %v504_v19 = vsub.f32 %v3189_v55, %v3227_v7  ;;  %461 = vmatpush.msrb.mxu2 %v3153_v12  ;;  %377 = vmatpush.msrb.mxu0 %v3072_v36 }
  0x3a   :  { %4976 = vst [vmem:[#allocation53_spill] sm:$0xff] %v3151_v8 }
  0x3b   :  { %4977 = vst [vmem:[#allocation54_spill] sm:$0xff] %v3153_v12  ;;  %463 = vmatpush.msrb.mxu2 %v3170_v32  ;;  %381 = vmatpush.msrb.mxu0 %v3095_v45 }
  0x3c   :  { %4978 = vst [vmem:[#allocation55_spill] sm:$0xff] %v3157_v13  ;;  %v3213_v13 = vand.u32 4294901760, %v217_v42  ;;  %v235_v42 = vsub.f32 %v3164_v30, %v3196_v54 }
  0x3d   :  { %4979 = vst [vmem:[#allocation56_spill] sm:$0xff] %v3161_v26  ;;  %v3301_v26 = vsub.f32 %v69_v49, %v3264_v37  ;;  %v3319_v49 = vsub.f32 %v68_v38, %v3282_v15  ;;  %v64_v38 = vld [vmem:[#allocation5 + $0xa0] sm:$0xff]  ;;  %465 = vmatpush.msrb.mxu2 %v3201_v61  ;;  %385 = vmatpush.msrb.mxu0 %v3111_v51 }
  0x3e   :  { %4980 = vst [vmem:[#allocation57_spill] sm:$0xff] %v3164_v30  ;;  %219 = vmatpush.msra.mxu1 %v3213_v13  ;;  %v3268_v62 = vand.u32 4294901760, %v235_v42  ;;  %v3276_v30 = vsub.f32 %v71_v18, %v3239_v48  ;;  %v67_v42 = vld [vmem:[#allocation5 + $0xb8] sm:$0xff]  ;;  %v253_v18 = vsub.f32 %v3206_v60, %v3244_v21  ;;  %v60_v51 = vld [vmem:[#allocation5 + $0x80] sm:$0xff] }
  0x3f   :  { %4981 = vst [vmem:[#allocation58_spill] sm:$0xff] %v3168_v31  ;;  %v3312_v22 = vand.u32 4294901760, %v67_v42  ;;  %467 = vmatpush.msrb.mxu2 %v3220_v56  ;;  %389 = vmatpush.msrb.mxu0 %v3130_v59  ;;  %v3444_v59 = vand.u32 4294901760, %v60_v51 }
  0x40   :  { %4982 = vst [vmem:[#allocation59_spill] sm:$0xff] %v3170_v32  ;;  %225 = vmatpush.msra.mxu1 %v3223_v6 }
  0x41   :  { %4983 = vst [vmem:[#allocation60_spill] sm:$0xff] %v3174_v39  ;;  %v70_v39 = vld [vmem:[#allocation5 + $0xd0] sm:$0xff]  ;;  %469 = vmatpush.msrb.mxu2 %v3239_v48  ;;  %393 = vmatpush.msrb.mxu0 %v3143_v1 }
  0x42   :  { %4984 = vst [vmem:[#allocation61_spill] sm:$0xff] %v3179_v44  ;;  %v3258_v2 = vand.u32 4294901760, %v70_v39  ;;  %231 = vmatpush.msra.mxu1 %v3251_v43  ;;  %v112_v1 = vld.sshfl [vmem:[#allocation1 + $0x8] sm:$0xff pattern:$0x73625140] }
  0x43   :  { %4985 = vst [vmem:[#allocation62_spill] sm:$0xff] %v3182_v47  ;;  %397 = vmatpush.msrb.mxu0 %v3151_v8 }
  0x44   :  { %4986 = vst [vmem:[#allocation63_spill] sm:$0xff] %v3189_v55  ;;  %v3294_v47 = vsub.f32 %v70_v39, %v3258_v2  ;;  %237 = vmatpush.msra.mxu1 %v3268_v62  ;;  %471 = vmatpush.msrb.mxu2 %v3258_v2 }
  0x45   :  { %4987 = vst [vmem:[#allocation64_spill] sm:$0xff] %v3193_v63  ;;  %v3247_v63 = vand.u32 4294901760, %v3209_v40  ;;  %401 = vmatpush.msrb.mxu0 %v3179_v44 }
  0x46   :  { %4988 = vst [vmem:[#allocation65_spill] sm:$0xff] %v3196_v54  ;;  %473 = vmatpush.msrb.mxu2 %v3264_v37 }
  0x47   :  { %4989 = vst [vmem:[#allocation66_spill] sm:$0xff] %v3199_v46  ;;  %v510_v16 = vsub.f32 %v3209_v40, %v3247_v63  ;;  %v522_v46 = vsub.f32 %v3256_v20, %v3291_v14  ;;  %405 = vmatpush.msrb.mxu0 %v3196_v54 }
  0x48   :  { %4990 = vst [vmem:[#allocation67_spill] sm:$0xff] %v3201_v61  ;;  %475 = vmatpush.msrb.mxu2 %v3282_v15 }
  0x49   :  { %4991 = vst [vmem:[#allocation68_spill] sm:$0xff] %v3206_v60  ;;  %v3344_v60 = vsub.f32 %v67_v42, %v3312_v22  ;;  %409 = vmatpush.msrb.mxu0 %v3218_v52 }
  0x4a   :  { %4992 = vst [vmem:[#allocation69_spill] sm:$0xff] %v3209_v40  ;;  %477 = vmatpush.msrb.mxu2 %v3312_v22 }
  0x4b   :  { %4993 = vst [vmem:[#allocation70_spill] sm:$0xff] %v3213_v13  ;;  %v3273_v13 = vand.u32 4294901760, %v3237_v53  ;;  %v3373_v27 = vand.u32 4294901760, %v3344_v60  ;;  %413 = vmatpush.msrb.mxu0 %v3234_v29 }
  0x4c   :  { %4994 = vst [vmem:[#allocation71_spill] sm:$0xff] %v3218_v52 }
  0x4d   :  { %4995 = vst [vmem:[#allocation72_spill] sm:$0xff] %v3220_v56  ;;  %v516_v39 = vsub.f32 %v3237_v53, %v3273_v13  ;;  %417 = vmatpush.msrb.mxu0 %v3244_v21 }
  0x4e   :  { %4996 = vst [vmem:[#allocation73_spill] sm:$0xff] %v3223_v6  ;;  %v3286_v6 = vand.u32 4294901760, %v241_v34  ;;  %v66_v34 = vld [vmem:[#allocation5 + $0xb0] sm:$0xff] }
  0x4f   :  { %4997 = vst [vmem:[#allocation74_spill] sm:$0xff] %v3227_v7  ;;  %v3310_v7 = vand.u32 4294901760, %v3276_v30  ;;  %v3330_v23 = vand.u32 4294901760, %v66_v34 }
  0x50   :  { %4998 = vst [vmem:[#allocation75_spill] sm:$0xff] %v3234_v29  ;;  %243 = vmatpush.msra.mxu1 %v3286_v6 }
  0x51   :  { %4999 = vst [vmem:[#allocation76_spill] sm:$0xff] %v3237_v53  ;;  %v3360_v24 = vsub.f32 %v66_v34, %v3330_v23  ;;  %479 = vmatpush.msrb.mxu2 %v3330_v23 }
  0x52   :  { %5000 = vst [vmem:[#allocation77_spill] sm:$0xff] %v3239_v48 }
  0x53   :  { %5001 = vst [vmem:[#allocation78_spill] sm:$0xff] %v3244_v21 }
  0x54   :  { %5002 = vst [vmem:[#allocation79_spill] sm:$0xff] %v3247_v63  ;;  %v3298_v63 = vand.u32 4294901760, %v504_v19  ;;  %v3316_v19 = vand.u32 4294901760, %v510_v16  ;;  %v3335_v16 = vand.u32 4294901760, %v3301_v26 }
  0x55   :  { %5003 = vst [vmem:[#allocation80_spill] sm:$0xff] %v3251_v43  ;;  %v3304_v43 = vand.u32 4294901760, %v247_v57  ;;  %v65_v57 = vld [vmem:[#allocation5 + $0xa8] sm:$0xff] }
  0x56   :  { %5004 = vst [vmem:[#allocation81_spill] sm:$0xff] %v3256_v20  ;;  %506 = vmatpush.msrb.mxu3 %v3298_v63 }
  0x57   :  { %5005 = vst [vmem:[#allocation82_spill] sm:$0xff] %v3258_v2  ;;  %249 = vmatpush.msra.mxu1 %v3304_v43 }
  0x58   :  { %5006 = vst [vmem:[#allocation83_spill] sm:$0xff] %v3264_v37  ;;  %512 = vmatpush.msrb.mxu3 %v3316_v19 }
  0x59   :  { %5007 = vst [vmem:[#allocation84_spill] sm:$0xff] %v3268_v62  ;;  %v3323_v62 = vand.u32 4294901760, %v253_v18  ;;  %v3339_v18 = vand.u32 4294901760, %v516_v39  ;;  %v3355_v39 = vand.u32 4294901760, %v522_v46 }
  0x5a   :  { %5008 = vst [vmem:[#allocation85_spill] sm:$0xff] %v3273_v13  ;;  %v3328_v13 = vand.u32 4294901760, %v3294_v47 }
  0x5b   :  { %5009 = vst [vmem:[#allocation86_spill] sm:$0xff] %v3276_v30  ;;  %255 = vmatpush.msra.mxu1 %v3323_v62  ;;  %518 = vmatpush.msrb.mxu3 %v3339_v18 }
  0x5c   :  { %5010 = vst [vmem:[#allocation87_spill] sm:$0xff] %v3282_v15  ;;  %v534_v42 = vsub.f32 %v3294_v47, %v3328_v13 }
  0x5d   :  { %5011 = vst [vmem:[#allocation88_spill] sm:$0xff] %v3286_v6  ;;  %v528_v6 = vsub.f32 %v3276_v30, %v3310_v7  ;;  %424 = vmatpush.msrb.mxu1 %v3001_v3  ;;  %v62_v3 = vld [vmem:[#allocation5 + $0x90] sm:$0xff]  ;;  %524 = vmatpush.msrb.mxu3 %v3355_v39 }
  0x5e   :  { %5012 = vst [vmem:[#allocation89_spill] sm:$0xff] %v3291_v14  ;;  %v3346_v14 = vand.u32 4294901760, %v65_v57 }
  0x5f   :  { %5013 = vst [vmem:[#allocation90_spill] sm:$0xff] %v3294_v47  ;;  %v3370_v46 = vand.u32 4294901760, %v528_v6  ;;  %426 = vmatpush.msrb.mxu1 %v3003_v4  ;;  %v3386_v6 = vand.u32 4294901760, %v534_v42  ;;  %v61_v4 = vld [vmem:[#allocation5 + $0x88] sm:$0xff]  ;;  %v552_v42 = vsub.f32 %v3344_v60, %v3373_v27 }
  0x60   :  { %5014 = vst [vmem:[#allocation91_spill] sm:$0xff] %v3298_v63  ;;  %v3351_v63 = vand.u32 4294901760, %v3319_v49  ;;  %v3376_v34 = vsub.f32 %v65_v57, %v3346_v14  ;;  %481 = vmatpush.msrb.mxu2 %v3346_v14 }
  0x61   :  { %5015 = vst [vmem:[#allocation92_spill] sm:$0xff] %v3301_v26  ;;  %428 = vmatpush.msrb.mxu1 %v3005_v5  ;;  %530 = vmatpush.msrb.mxu3 %v3370_v46 }
  0x62   :  { %5016 = vst [vmem:[#allocation93_spill] sm:$0xff] %v3304_v43  ;;  %v63_v43 = vld [vmem:[#allocation5 + $0x98] sm:$0xff]  ;;  %v546_v33 = vsub.f32 %v3319_v49, %v3351_v63 }
  0x63   :  { %5017 = vst [vmem:[#allocation94_spill] sm:$0xff] %v3310_v7  ;;  %v3362_v7 = vand.u32 4294901760, %v64_v38  ;;  %430 = vmatpush.msrb.mxu1 %v3007_v9  ;;  %536 = vmatpush.msrb.mxu3 %v3386_v6 }
  0x64   :  { %5018 = vst [vmem:[#allocation95_spill] sm:$0xff] %v3312_v22 }
  0x65   :  { %5019 = vst [vmem:[#allocation96_spill] sm:$0xff] %v3316_v19  ;;  %v540_v19 = vsub.f32 %v3301_v26, %v3335_v16  ;;  %v3392_v57 = vsub.f32 %v64_v38, %v3362_v7  ;;  %v3407_v38 = vand.u32 4294901760, %v62_v3  ;;  %432 = vmatpush.msrb.mxu1 %v3009_v10  ;;  %483 = vmatpush.msrb.mxu2 %v3362_v7 }
  0x66   :  { %5020 = vst [vmem:[#allocation97_spill] sm:$0xff] %v3319_v49 }
  0x67   :  { %5021 = vst [vmem:[#allocation98_spill] sm:$0xff] %v3323_v62  ;;  %v111_v62 = vld.sshfl [vmem:[#allocation1] sm:$0xff pattern:$0x73625140]  ;;  %v3398_v36 = vand.u32 4294901760, %v540_v19  ;;  %v3414_v19 = vand.u32 4294901760, %v546_v33  ;;  %434 = vmatpush.msrb.mxu1 %v3011_v11 }
  0x68   :  { %5022 = vst [vmem:[#allocation99_spill] sm:$0xff] %v3328_v13  ;;  %v3378_v13 = vand.u32 4294901760, %v63_v43  ;;  %v3421_v45 = vand.u32 4294901760, %v3392_v57  ;;  %v3432_v33 = vand.u32 4294901760, %v552_v42 }
  0x69   :  { %5023 = vst [vmem:[#allocation100_spill] sm:$0xff] %v3330_v23  ;;  %542 = vmatpush.msrb.mxu3 %v3398_v36  ;;  %436 = vmatpush.msrb.mxu1 %v3024_v17  ;;  %v3480_v17 = vand.u32 4294901760, %v112_v1 }
  0x6a   :  { %5024 = vst [vmem:[#allocation101_spill] sm:$0xff] %v3335_v16  ;;  %v3394_v16 = vand.u32 4294901760, %v111_v62  ;;  %485 = vmatpush.msrb.mxu2 %v3378_v13 }
  0x6b   :  { %5025 = vst [vmem:[#allocation102_spill] sm:$0xff] %v3339_v18  ;;  %v3389_v18 = vand.u32 4294901760, %v3360_v24  ;;  %548 = vmatpush.msrb.mxu3 %v3414_v19  ;;  %438 = vmatpush.msrb.mxu1 %v3046_v25 }
  0x6c   :  { %5026 = vst [vmem:[#allocation103_spill] sm:$0xff] %v3344_v60  ;;  %v3424_v5 = vsub.f32 %v111_v62, %v3394_v16  ;;  %v3440_v62 = vsub.f32 %v62_v3, %v3407_v38  ;;  %487 = vmatpush.msrb.mxu2 %v3407_v38  ;;  %257 = vmatmul.f32.vlgmr.msra.gmra.mxu1 %v3394_v16 }
  0x6d   :  { %5027 = vst [vmem:[#allocation104_spill] sm:$0xff] %v3346_v14  ;;  %554 = vmatpush.msrb.mxu3 %v3432_v33  ;;  %440 = vmatpush.msrb.mxu1 %v3052_v28 }
  0x6e   :  { %5028 = vst [vmem:[#allocation105_spill] sm:$0xff] %v3351_v63  ;;  %v3410_v63 = vsub.f32 %v63_v43, %v3378_v13  ;;  %v3426_v43 = vand.u32 4294901760, %v61_v4  ;;  %v153_v10 = vand.u32 4294901760, %v3424_v5  ;;  %v3465_v11 = vand.u32 4294901760, %v3440_v62  ;;  %311 = vmatmul.f32.vlgmr.msra.gmra.mxu2 %v3424_v5 }
  0x6f   :  { %5029 = vst [vmem:[#allocation106_spill] sm:$0xff] %v3355_v39  ;;  %v3405_v39 = vand.u32 4294901760, %v3376_v34  ;;  %442 = vmatpush.msrb.mxu1 %v3069_v35 }
  0x70   :  { %5030 = vst [vmem:[#allocation107_spill] sm:$0xff] %v3360_v24  ;;  %v3437_v9 = vand.u32 4294901760, %v3410_v63  ;;  %v3454_v3 = vsub.f32 %v61_v4, %v3426_v43  ;;  %v3470_v4 = vsub.f32 %v60_v51, %v3444_v59  ;;  %489 = vmatpush.msrb.mxu2 %v3426_v43  ;;  %350 = vmatmul.f32.vlgmr.msra.gmra.mxu3 %v153_v10 }
  0x71   :  { %5031 = vst [vmem:[#allocation108_spill] sm:$0xff] %v3362_v7  ;;  %444 = vmatpush.msrb.mxu1 %v3086_v41 }
  0x72   :  { %5032 = vst [vmem:[#allocation109_spill] sm:$0xff] %v3370_v46  ;;  %v558_v46 = vsub.f32 %v3360_v24, %v3389_v18  ;;  %v3478_v8 = vand.u32 4294901760, %v3454_v3  ;;  %491 = vmatpush.msrb.mxu2 %v3444_v59 }
  0x73   :  { %5033 = vst [vmem:[#allocation110_spill] sm:$0xff] %v3373_v27  ;;  %446 = vmatpush.msrb.mxu1 %v3108_v50  ;;  %v100_v50 = vld [vmem:[#allocation5 + $0x1c0] sm:$0xff] }
  0x74   :  { %5034 = vst [vmem:[#allocation111_spill] sm:$0xff] %v3376_v34  ;;  %v3448_v42 = vand.u32 4294901760, %v558_v46  ;;  %v576_v46 = vsub.f32 %v3410_v63, %v3437_v9  ;;  %v3912_v35 = vand.u32 4294901760, %v100_v50 }
  0x75   :  { %5035 = vst [vmem:[#allocation112_spill] sm:$0xff] %v3378_v13  ;;  %448 = vmatpush.msrb.mxu1 %v3127_v58 }
  0x76   :  { %5036 = vst [vmem:[#allocation113_spill] sm:$0xff] %v3386_v6  ;;  %v564_v6 = vsub.f32 %v3376_v34, %v3405_v39  ;;  %560 = vmatpush.msrb.mxu3 %v3448_v42  ;;  %v3486_v51 = vand.u32 4294901760, %v576_v46  ;;  %v3500_v46 = vsub.f32 %v112_v1, %v3480_v17 }
  0x77   :  { %5037 = vst [vmem:[#allocation114_spill] sm:$0xff] %v3389_v18  ;;  %450 = vmatpush.msrb.mxu1 %v3140_v0 }
  0x78   :  { %5038 = vst [vmem:[#allocation115_spill] sm:$0xff] %v3392_v57 }
  0x79   :  { %5039 = vst [vmem:[#allocation116_spill] sm:$0xff] %v3398_v36  ;;  %v570_v36 = vsub.f32 %v3392_v57, %v3421_v45 }
  0x7a   :  { %5040 = vst [vmem:[#allocation117_spill] sm:$0xff] %v3405_v39 }
  0x7b   :  { %5041 = vst [vmem:[#allocation118_spill] sm:$0xff] %v3407_v38 }
  0x7c   :  { %5042 = vst [vmem:[#allocation119_spill] sm:$0xff] %v3410_v63 }
  0x7d   :  { %5043 = vst [vmem:[#allocation120_spill] sm:$0xff] %v3414_v19  ;;  %v3460_v19 = vand.u32 4294901760, %v564_v6  ;;  %v154_v6 = vsub.f32 %v3424_v5, %v153_v10  ;;  %v5063_v5 = vld [vmem:[#allocation56_spill] sm:$0xff]  ;;  %v5065_v10 = vld [vmem:[#allocation85_spill] sm:$0xff] }
  0x7e   :  { %5044 = vst [vmem:[#allocation121_spill] sm:$0xff] %v3421_v45  ;;  %452 = vmatpush.msrb.mxu1 %v5063_v5 }
  0x7f   :  { %5045 = vst [vmem:[#allocation122_spill] sm:$0xff] %v3426_v43  ;;  %566 = vmatpush.msrb.mxu3 %v3460_v19  ;;  %v155_v54 = vand.u32 4294901760, %v154_v6 }
  0x80   :  { %5046 = vst [vmem:[#allocation123_spill] sm:$0xff] %v3432_v33  ;;  %v3474_v33 = vand.u32 4294901760, %v570_v36  ;;  %v582_v36 = vsub.f32 %v3440_v62, %v3465_v11  ;;  %454 = vmatpush.msrb.mxu1 %v3168_v31 }
  0x81   :  { %5047 = vst [vmem:[#allocation124_spill] sm:$0xff] %v3437_v9  ;;  %156 = vmatmul.f32.vlgmr.msra.gmra.mxu0 %v155_v54  ;;  %456 = vmatmul.f32.vlgmr.msrb.gmra.mxu1 %v3394_v16 }
  0x82   :  { %5048 = vst [vmem:[#allocation125_spill] sm:$0xff] %v3440_v62  ;;  %572 = vmatpush.msrb.mxu3 %v3474_v33  ;;  %v3506_v52 = vand.u32 4294901760, %v582_v36  ;;  %604 = vmatpush.msra.mxu0 %v3189_v55 }
  0x83   :  { %5049 = vst [vmem:[#allocation126_spill] sm:$0xff] %v3444_v59  ;;  %657 = vmatpush.msra.mxu1 %v3153_v12 }
  0x84   :  { %5050 = vst [vmem:[#allocation127_spill] sm:$0xff] %v3448_v42  ;;  %v3493_v42 = vand.u32 4294901760, %v3470_v4  ;;  %578 = vmatpush.msrb.mxu3 %v3486_v51  ;;  %607 = vmatpush.msra.mxu0 %v3209_v40 }
  0x85   :  { %5051 = vst [vmem:[#allocation128_spill] sm:$0xff] %v3454_v3  ;;  %659 = vmatpush.msra.mxu1 %v3170_v32 }
  0x86   :  { %5052 = vst [vmem:[#allocation129_spill] sm:$0xff] %v3460_v19  ;;  %v588_v19 = vsub.f32 %v3454_v3, %v3478_v8  ;;  %v594_v6 = vsub.f32 %v3470_v4, %v3493_v42  ;;  %584 = vmatpush.msrb.mxu3 %v3506_v52  ;;  %610 = vmatpush.msra.mxu0 %v3237_v53 }
  0x87   :  { %5053 = vst [vmem:[#allocation130_spill] sm:$0xff] %v3465_v11  ;;  %661 = vmatpush.msra.mxu1 %v3201_v61 }
  0x88   :  { %5054 = vst [vmem:[#allocation131_spill] sm:$0xff] %v3470_v4  ;;  %v3513_v1 = vand.u32 4294901760, %v588_v19  ;;  %v3522_v36 = vand.u32 4294901760, %v594_v6  ;;  %v5062_v19 = vld [vmem:[#allocation74_spill] sm:$0xff]  ;;  %613 = vmatpush.msra.mxu0 %v3256_v20  ;;  %v5064_v6 = vld [vmem:[#allocation79_spill] sm:$0xff] }
  0x89   :  { %5055 = vst [vmem:[#allocation132_spill] sm:$0xff] %v3474_v33  ;;  %v4740_v33 = vand.u32 4294901760, %v3500_v46  ;;  %698 = vmatpush.msra.mxu2 %v5062_v19  ;;  %419 = vmatmul.f32.vlgmr.msrb.gmra.mxu0 %v3394_v16  ;;  %v5070_v16 = vld [vmem:[#allocation105_spill] sm:$0xff] }
  0x8a   :  { %5056 = vst [vmem:[#allocation133_spill] sm:$0xff] %v3478_v8  ;;  %590 = vmatpush.msrb.mxu3 %v3513_v1  ;;  %616 = vmatpush.msra.mxu0 %v3276_v30  ;;  %v82_v30 = vld [vmem:[#allocation5 + $0x130] sm:$0xff] }
  0x8b   :  { %5057 = vst [vmem:[#allocation134_spill] sm:$0xff] %v3486_v51  ;;  %v495_v54 = vsub.f32 %v3500_v46, %v4740_v33  ;;  %702 = vmatpush.msra.mxu2 %v5064_v6  ;;  %v5066_v33 = vld [vmem:[#allocation89_spill] sm:$0xff]  ;;  %663 = vmatpush.msra.mxu1 %v3220_v56  ;;  %v3678_v40 = vand.u32 4294901760, %v82_v30 }
  0x8c   :  { %5058 = vst [vmem:[#allocation135_spill] sm:$0xff] %v3493_v42  ;;  %596 = vmatpush.msrb.mxu3 %v3522_v36  ;;  %619 = vmatpush.msra.mxu0 %v3294_v47 }
  0x8d   :  { %5059 = vst [vmem:[#allocation136_spill] sm:$0xff] %v3506_v52  ;;  %706 = vmatpush.msra.mxu2 %v5065_v10  ;;  %598 = vmatmul.f32.vlgmr.msrb.gmra.mxu3 %v3480_v17  ;;  %v80_v52 = vld [vmem:[#allocation5 + $0x120] sm:$0xff]  ;;  %v3714_v51 = vsub.f32 %v82_v30, %v3678_v40 }
  0x8e   :  { %5060 = vst [vmem:[#allocation137_spill] sm:$0xff] %v3513_v1  ;;  %v496_v1 = vand.u32 4294901760, %v495_v54  ;;  %765 = vmatpush.msra.mxu3 %v3153_v12  ;;  %622 = vmatpush.msra.mxu0 %v3301_v26  ;;  %v5067_v54 = vld [vmem:[#allocation94_spill] sm:$0xff]  ;;  %v5069_v26 = vld [vmem:[#allocation101_spill] sm:$0xff]  ;;  %v3708_v55 = vand.u32 4294901760, %v80_v52 }
  0x8f   :  { %5061 = vst [vmem:[#allocation138_spill] sm:$0xff] %v3522_v36  ;;  %710 = vmatpush.msra.mxu2 %v5066_v33  ;;  %665 = vmatpush.msra.mxu1 %v3239_v48  ;;  %v83_v33 = vld [vmem:[#allocation5 + $0x138] sm:$0xff]  ;;  %v3745_v29 = vand.u32 4294901760, %v3714_v51 }
  0x90   :  { %767 = vmatpush.msra.mxu3 %v3170_v32  ;;  %497 = vmatmul.f32.vlgmr.msrb.gmra.mxu2 %v496_v1  ;;  %v5068_v1 = vld [vmem:[#allocation99_spill] sm:$0xff]  ;;  %v3662_v20 = vand.u32 4294901760, %v83_v33  ;;  %5098 = vst [vmem:[#allocation165_spill] sm:$0xff] %v3714_v51  ;;  %v103_v12 = vld [vmem:[#allocation5 + $0x1d8] sm:$0xff] }
  0x91   :  { %714 = vmatpush.msra.mxu2 %v5067_v54  ;;  %625 = vmatpush.msra.mxu0 %v3319_v49  ;;  %v84_v49 = vld [vmem:[#allocation5 + $0x140] sm:$0xff]  ;;  %5103 = vst [vmem:[#allocation170_spill] sm:$0xff] %v3745_v29  ;;  %v3855_v5 = vand.u32 4294901760, %v103_v12 }
  0x92   :  { %769 = vmatpush.msra.mxu3 %v3201_v61  ;;  %667 = vmatpush.msra.mxu1 %v3258_v2  ;;  %v3646_v47 = vand.u32 4294901760, %v84_v49 }
  0x93   :  { %718 = vmatpush.msra.mxu2 %v5068_v1  ;;  %628 = vmatpush.msra.mxu0 %v3344_v60  ;;  %v91_v1 = vld [vmem:[#allocation5 + $0x178] sm:$0xff] }
  0x94   :  { %771 = vmatpush.msra.mxu3 %v3220_v56  ;;  %669 = vmatpush.msra.mxu1 %v3264_v37  ;;  %v104_v56 = vld [vmem:[#allocation5 + $0x1e0] sm:$0xff] }
  0x95   :  { %722 = vmatpush.msra.mxu2 %v5069_v26  ;;  %631 = vmatpush.msra.mxu0 %v3360_v24  ;;  %v90_v24 = vld [vmem:[#allocation5 + $0x170] sm:$0xff]  ;;  %v87_v26 = vld [vmem:[#allocation5 + $0x158] sm:$0xff] }
  0x96   :  { %773 = vmatpush.msra.mxu3 %v3239_v48  ;;  %671 = vmatpush.msra.mxu1 %v3282_v15 }
  0x97   :  { %726 = vmatpush.msra.mxu2 %v5070_v16  ;;  %634 = vmatpush.msra.mxu0 %v3376_v34  ;;  %v3573_v16 = vand.u32 4294901760, %v91_v1  ;;  %v89_v34 = vld [vmem:[#allocation5 + $0x168] sm:$0xff] }
  0x98   :  { %775 = vmatpush.msra.mxu3 %v3258_v2  ;;  %673 = vmatpush.msra.mxu1 %v3312_v22 }
  0x99   :  { %730 = vmatpush.msra.mxu2 %v3373_v27  ;;  %637 = vmatpush.msra.mxu0 %v3392_v57  ;;  %5071 = vst [vmem:[#allocation139_spill] sm:$0xff] %v3573_v16  ;;  %v3579_v27 = vand.u32 4294901760, %v90_v24  ;;  %v3585_v57 = vand.u32 4294901760, %v89_v34 }
  0x9a   :  { %777 = vmatpush.msra.mxu3 %v3264_v37  ;;  %675 = vmatpush.msra.mxu1 %v3330_v23 }
  0x9b   :  { %734 = vmatpush.msra.mxu2 %v3389_v18  ;;  %640 = vmatpush.msra.mxu0 %v3410_v63  ;;  %5072 = vst [vmem:[#allocation140_spill] sm:$0xff] %v3579_v27  ;;  %v88_v18 = vld [vmem:[#allocation5 + $0x160] sm:$0xff]  ;;  %v3588_v63 = vsub.f32 %v91_v1, %v3573_v16  ;;  %v3601_v1 = vand.u32 4294901760, %v87_v26 }
  0x9c   :  { %779 = vmatpush.msra.mxu3 %v3282_v15  ;;  %5073 = vst [vmem:[#allocation141_spill] sm:$0xff] %v3585_v57  ;;  %677 = vmatpush.msra.mxu1 %v3346_v14 }
  0x9d   :  { %738 = vmatpush.msra.mxu2 %v3405_v39  ;;  %643 = vmatpush.msra.mxu0 %v3440_v62  ;;  %5074 = vst [vmem:[#allocation142_spill] sm:$0xff] %v3588_v63  ;;  %v3594_v62 = vand.u32 4294901760, %v88_v18  ;;  %v86_v39 = vld [vmem:[#allocation5 + $0x150] sm:$0xff] }
  0x9e   :  { %781 = vmatpush.msra.mxu3 %v3312_v22  ;;  %679 = vmatpush.msra.mxu1 %v3362_v7  ;;  %5077 = vst [vmem:[#allocation145_spill] sm:$0xff] %v3601_v1  ;;  %v106_v22 = vld [vmem:[#allocation5 + $0x1f0] sm:$0xff] }
  0x9f   :  { %742 = vmatpush.msra.mxu2 %v3421_v45  ;;  %646 = vmatpush.msra.mxu0 %v3454_v3  ;;  %5075 = vst [vmem:[#allocation143_spill] sm:$0xff] %v3594_v62  ;;  %v3597_v45 = vsub.f32 %v90_v24, %v3579_v27  ;;  %v3609_v3 = vsub.f32 %v89_v34, %v3585_v57  ;;  %v3613_v24 = vand.u32 4294901760, %v86_v39  ;;  %v3813_v48 = vand.u32 4294901760, %v106_v22 }
  0xa0   :  { %783 = vmatpush.msra.mxu3 %v3330_v23  ;;  %681 = vmatpush.msra.mxu1 %v3378_v13  ;;  %v3621_v60 = vsub.f32 %v88_v18, %v3594_v62  ;;  %v3626_v34 = vsub.f32 %v87_v26, %v3601_v1  ;;  %v107_v23 = vld [vmem:[#allocation5 + $0x1f8] sm:$0xff] }
  0xa1   :  { %746 = vmatpush.msra.mxu2 %v3437_v9  ;;  %5076 = vst [vmem:[#allocation144_spill] sm:$0xff] %v3597_v45  ;;  %649 = vmatpush.msra.mxu0 %v3470_v4  ;;  %v3606_v9 = vand.u32 4294901760, %v3588_v63  ;;  %v85_v4 = vld [vmem:[#allocation5 + $0x148] sm:$0xff]  ;;  %v3635_v18 = vand.u32 4294901760, %v3609_v3  ;;  %v3640_v26 = vsub.f32 %v86_v39, %v3613_v24 }
  0xa2   :  { %785 = vmatpush.msra.mxu3 %v3346_v14  ;;  %5079 = vst [vmem:[#allocation147_spill] sm:$0xff] %v3609_v3  ;;  %652 = vmatmul.f32.vlgmr.msra.gmra.mxu0 %v3500_v46  ;;  %v3632_v54 = vand.u32 4294901760, %v85_v4  ;;  %v3649_v10 = vand.u32 4294901760, %v3621_v60  ;;  %v3654_v39 = vand.u32 4294901760, %v3626_v34 }
  0xa3   :  { %750 = vmatpush.msra.mxu2 %v3465_v11  ;;  %5078 = vst [vmem:[#allocation146_spill] sm:$0xff] %v3606_v9  ;;  %802 = vmatpush.msrb.mxu0 %v3573_v16  ;;  %v3618_v11 = vand.u32 4294901760, %v3597_v45  ;;  %v857_v6 = vsub.f32 %v3609_v3, %v3635_v18  ;;  %v3670_v19 = vand.u32 4294901760, %v3640_v26 }
  0xa4   :  { %787 = vmatpush.msra.mxu3 %v3362_v7  ;;  %5081 = vst [vmem:[#allocation149_spill] sm:$0xff] %v3621_v60  ;;  %683 = vmatpush.msra.mxu1 %v3407_v38  ;;  %v3665_v36 = vsub.f32 %v85_v4, %v3632_v54  ;;  %v863_v53 = vsub.f32 %v3621_v60, %v3649_v10  ;;  %v77_v7 = vld [vmem:[#allocation5 + $0x108] sm:$0xff] }
  0xa5   :  { %754 = vmatpush.msra.mxu2 %v3478_v8  ;;  %5080 = vst [vmem:[#allocation148_spill] sm:$0xff] %v3618_v11  ;;  %804 = vmatpush.msrb.mxu0 %v3579_v27  ;;  %v845_v8 = vsub.f32 %v3588_v63, %v3606_v9  ;;  %v3681_v4 = vsub.f32 %v84_v49, %v3646_v47 }
  0xa6   :  { %789 = vmatpush.msra.mxu3 %v3378_v13  ;;  %5082 = vst [vmem:[#allocation150_spill] sm:$0xff] %v3626_v34  ;;  %685 = vmatpush.msra.mxu1 %v3426_v43  ;;  %v3695_v49 = vand.u32 4294901760, %v3665_v36 }
  0xa7   :  { %758 = vmatpush.msra.mxu2 %v3493_v42  ;;  %5083 = vst [vmem:[#allocation151_spill] sm:$0xff] %v3635_v18  ;;  %806 = vmatpush.msrb.mxu0 %v3585_v57  ;;  %v851_v42 = vsub.f32 %v3597_v45, %v3618_v11 }
  0xa8   :  { %791 = vmatpush.msra.mxu3 %v3407_v38  ;;  %760 = vmatmul.f32.vlgmr.msra.gmra.mxu2 %v3480_v17  ;;  %5084 = vst [vmem:[#allocation152_spill] sm:$0xff] %v3640_v26  ;;  %v78_v38 = vld [vmem:[#allocation5 + $0x110] sm:$0xff] }
  0xa9   :  { %945 = vmatpush.msrb.mxu2 %v3588_v63  ;;  %5085 = vst [vmem:[#allocation153_spill] sm:$0xff] %v3649_v10  ;;  %808 = vmatpush.msrb.mxu0 %v3594_v62  ;;  %v3658_v63 = vand.u32 4294901760, %v845_v8  ;;  %v3674_v8 = vand.u32 4294901760, %v851_v42  ;;  %v3690_v42 = vand.u32 4294901760, %v857_v6  ;;  %v3706_v6 = vand.u32 4294901760, %v863_v53 }
  0xaa   :  { %793 = vmatpush.msra.mxu3 %v3426_v43  ;;  %5086 = vst [vmem:[#allocation154_spill] sm:$0xff] %v3654_v39  ;;  %687 = vmatpush.msra.mxu1 %v3444_v59  ;;  %v881_v53 = vsub.f32 %v3665_v36, %v3695_v49 }
  0xab   :  { %5087 = vst [vmem:[#allocation155_spill] sm:$0xff] %v3658_v63  ;;  %948 = vmatpush.msrb.mxu2 %v3597_v45  ;;  %810 = vmatpush.msrb.mxu0 %v3601_v1  ;;  %v5092_v45 = vand.u32 4294901760, %v3500_v46  ;;  %v3698_v46 = vsub.f32 %v83_v33, %v3662_v20  ;;  %v3711_v33 = vand.u32 4294901760, %v3681_v4 }
  0xac   :  { %795 = vmatpush.msra.mxu3 %v3444_v59  ;;  %5088 = vst [vmem:[#allocation156_spill] sm:$0xff] %v3665_v36  ;;  %v869_v59 = vsub.f32 %v3626_v34, %v3654_v39  ;;  %847 = vmatpush.msrb.mxu1 %v3658_v63  ;;  %v875_v63 = vsub.f32 %v3640_v26, %v3670_v19 }
  0xad   :  { %797 = vmatmul.f32.vlgmr.msra.gmra.mxu3 %v3480_v17  ;;  %5089 = vst [vmem:[#allocation157_spill] sm:$0xff] %v3670_v19  ;;  %v81_v17 = vld [vmem:[#allocation5 + $0x128] sm:$0xff]  ;;  %691 = vmatmul.f32.vlgmr.msra.gmra.mxu1 %v5092_v45  ;;  %v113_v45 = vld.sshfl [vmem:[#allocation1 + $0x10] sm:$0xff pattern:$0x73625140]  ;;  %v3729_v30 = vand.u32 4294901760, %v3698_v46 }
  0xae   :  { %998 = vmatpush.msrb.mxu3 %v3573_v16  ;;  %5090 = vst [vmem:[#allocation158_spill] sm:$0xff] %v3674_v8  ;;  %951 = vmatpush.msrb.mxu2 %v3609_v3  ;;  %v3692_v43 = vand.u32 4294901760, %v81_v17  ;;  %v79_v3 = vld [vmem:[#allocation5 + $0x118] sm:$0xff] }
  0xaf   :  { %5091 = vst [vmem:[#allocation159_spill] sm:$0xff] %v3681_v4  ;;  %812 = vmatpush.msrb.mxu0 %v3613_v24  ;;  %853 = vmatpush.msrb.mxu1 %v3674_v8  ;;  %v3720_v8 = vand.u32 4294901760, %v113_v45  ;;  %v3726_v21 = vand.u32 4294901760, %v79_v3 }
  0xb0   :  { %1000 = vmatpush.msrb.mxu3 %v3579_v27  ;;  %5093 = vst [vmem:[#allocation160_spill] sm:$0xff] %v3690_v42  ;;  %954 = vmatpush.msrb.mxu2 %v3621_v60  ;;  %v3718_v60 = vand.u32 4294901760, %v869_v59  ;;  %v3732_v13 = vsub.f32 %v81_v17, %v3692_v43  ;;  %v3736_v59 = vand.u32 4294901760, %v875_v63  ;;  %v3748_v17 = vsub.f32 %v80_v52, %v3708_v55 }
  0xb1   :  { %5094 = vst [vmem:[#allocation161_spill] sm:$0xff] %v3695_v49  ;;  %814 = vmatpush.msrb.mxu0 %v3632_v54  ;;  %859 = vmatpush.msrb.mxu1 %v3690_v42  ;;  %v887_v42 = vsub.f32 %v3681_v4, %v3711_v33  ;;  %v3753_v63 = vsub.f32 %v113_v45, %v3720_v8  ;;  %v3769_v45 = vand.u32 4294901760, %v77_v7 }
  0xb2   :  { %5095 = vst [vmem:[#allocation162_spill] sm:$0xff] %v3698_v46  ;;  %1002 = vmatpush.msrb.mxu3 %v3585_v57  ;;  %957 = vmatpush.msrb.mxu2 %v3626_v34  ;;  %v3742_v34 = vand.u32 4294901760, %v78_v38  ;;  %v3762_v52 = vand.u32 4294901760, %v3732_v13  ;;  %v3765_v14 = vsub.f32 %v79_v3, %v3726_v21  ;;  %v3778_v3 = vand.u32 4294901760, %v3748_v17 }
  0xb3   :  { %5096 = vst [vmem:[#allocation163_spill] sm:$0xff] %v3706_v6  ;;  %816 = vmatpush.msrb.mxu0 %v3646_v47  ;;  %865 = vmatpush.msrb.mxu1 %v3706_v6  ;;  %v3757_v6 = vand.u32 4294901760, %v881_v53  ;;  %v3773_v53 = vand.u32 4294901760, %v887_v42 }
  0xb4   :  { %5097 = vst [vmem:[#allocation164_spill] sm:$0xff] %v3711_v33  ;;  %1004 = vmatpush.msrb.mxu3 %v3594_v62  ;;  %960 = vmatpush.msrb.mxu2 %v3640_v26  ;;  %v893_v26 = vsub.f32 %v3698_v46, %v3729_v30  ;;  %v3781_v44 = vsub.f32 %v78_v38, %v3742_v34  ;;  %v3797_v37 = vand.u32 4294901760, %v3765_v14 }
  0xb5   :  { %5099 = vst [vmem:[#allocation166_spill] sm:$0xff] %v3718_v60  ;;  %818 = vmatpush.msrb.mxu0 %v3662_v20  ;;  %871 = vmatpush.msrb.mxu1 %v3718_v60  ;;  %v76_v60 = vld [vmem:[#allocation5 + $0x100] sm:$0xff]  ;;  %v905_v15 = vsub.f32 %v3732_v13, %v3762_v52 }
  0xb6   :  { %5100 = vst [vmem:[#allocation167_spill] sm:$0xff] %v3729_v30  ;;  %1006 = vmatpush.msrb.mxu3 %v3601_v1  ;;  %963 = vmatpush.msrb.mxu2 %v3665_v36  ;;  %v899_v36 = vsub.f32 %v3714_v51, %v3745_v29  ;;  %v3790_v42 = vand.u32 4294901760, %v893_v26  ;;  %v3794_v38 = vand.u32 4294901760, %v76_v60  ;;  %v3811_v2 = vand.u32 4294901760, %v3781_v44 }
  0xb7   :  { %5101 = vst [vmem:[#allocation168_spill] sm:$0xff] %v3732_v13  ;;  %820 = vmatpush.msrb.mxu0 %v3678_v40  ;;  %877 = vmatpush.msrb.mxu1 %v3736_v59  ;;  %v917_v61 = vsub.f32 %v3765_v14, %v3797_v37 }
  0xb8   :  { %5102 = vst [vmem:[#allocation169_spill] sm:$0xff] %v3736_v59  ;;  %1008 = vmatpush.msrb.mxu3 %v3613_v24  ;;  %966 = vmatpush.msrb.mxu2 %v3681_v4  ;;  %v3786_v59 = vand.u32 4294901760, %v107_v23  ;;  %v3802_v4 = vsub.f32 %v77_v7, %v3769_v45  ;;  %v3806_v26 = vand.u32 4294901760, %v899_v36  ;;  %v5118_v7 = vand.u32 4294901760, %v3753_v63 }
  0xb9   :  { %5104 = vst [vmem:[#allocation171_spill] sm:$0xff] %v3748_v17  ;;  %822 = vmatpush.msrb.mxu0 %v3692_v43  ;;  %883 = vmatpush.msrb.mxu1 %v3757_v6  ;;  %v3830_v32 = vsub.f32 %v76_v60, %v3794_v38  ;;  %v923_v60 = vsub.f32 %v3781_v44, %v3811_v2 }
  0xba   :  { %5105 = vst [vmem:[#allocation172_spill] sm:$0xff] %v3757_v6  ;;  %1010 = vmatpush.msrb.mxu3 %v3632_v54  ;;  %969 = vmatpush.msrb.mxu2 %v3698_v46  ;;  %v105_v6 = vld [vmem:[#allocation5 + $0x1e8] sm:$0xff]  ;;  %v911_v46 = vsub.f32 %v3748_v17, %v3778_v3  ;;  %v3821_v36 = vsub.f32 %v107_v23, %v3786_v59  ;;  %v3837_v23 = vand.u32 4294901760, %v3802_v4 }
  0xbb   :  { %5106 = vst [vmem:[#allocation173_spill] sm:$0xff] %v3762_v52  ;;  %824 = vmatpush.msrb.mxu0 %v3708_v55  ;;  %889 = vmatpush.msrb.mxu1 %v3773_v53 }
  0xbc   :  { %5107 = vst [vmem:[#allocation174_spill] sm:$0xff] %v3765_v14  ;;  %1012 = vmatpush.msrb.mxu3 %v3646_v47  ;;  %972 = vmatpush.msrb.mxu2 %v3714_v51  ;;  %v3825_v51 = vand.u32 4294901760, %v905_v15  ;;  %v3843_v15 = vand.u32 4294901760, %v911_v46  ;;  %v3853_v31 = vand.u32 4294901760, %v3821_v36  ;;  %v3859_v46 = vand.u32 4294901760, %v917_v61 }
  0xbd   :  { %5108 = vst [vmem:[#allocation175_spill] sm:$0xff] %v3773_v53  ;;  %826 = vmatpush.msrb.mxu0 %v3726_v21  ;;  %v836_v53 = vsub.f32 %v3753_v63, %v5118_v7  ;;  %895 = vmatpush.msrb.mxu1 %v3790_v42  ;;  %v3839_v7 = vand.u32 4294901760, %v104_v56  ;;  %v3876_v61 = vand.u32 4294901760, %v923_v60 }
  0xbe   :  { %5109 = vst [vmem:[#allocation176_spill] sm:$0xff] %v3778_v3  ;;  %1014 = vmatpush.msrb.mxu3 %v3662_v20  ;;  %975 = vmatpush.msrb.mxu2 %v3732_v13  ;;  %v3832_v13 = vand.u32 4294901760, %v105_v6 }
  0xbf   :  { %5110 = vst [vmem:[#allocation177_spill] sm:$0xff] %v3781_v44  ;;  %828 = vmatpush.msrb.mxu0 %v3742_v34  ;;  %901 = vmatpush.msrb.mxu1 %v3806_v26 }
  0xc0   :  { %5111 = vst [vmem:[#allocation178_spill] sm:$0xff] %v3786_v59  ;;  %1016 = vmatpush.msrb.mxu3 %v3678_v40  ;;  %978 = vmatpush.msrb.mxu2 %v3748_v17  ;;  %v837_v17 = vand.u32 4294901760, %v836_v53  ;;  %v3865_v0 = vsub.f32 %v105_v6, %v3832_v13  ;;  %v929_v53 = vsub.f32 %v3802_v4, %v3837_v23 }
  0xc1   :  { %5112 = vst [vmem:[#allocation179_spill] sm:$0xff] %v3790_v42  ;;  %v3848_v42 = vsub.f32 %v106_v22, %v3813_v48  ;;  %830 = vmatpush.msrb.mxu0 %v3769_v45  ;;  %907 = vmatpush.msrb.mxu1 %v3825_v51  ;;  %v3862_v22 = vand.u32 4294901760, %v3830_v32 }
  0xc2   :  { %5113 = vst [vmem:[#allocation180_spill] sm:$0xff] %v3794_v38  ;;  %1018 = vmatpush.msrb.mxu3 %v3692_v43  ;;  %981 = vmatpush.msrb.mxu2 %v3765_v14  ;;  %v3872_v14 = vsub.f32 %v104_v56, %v3839_v7  ;;  %v3887_v56 = vsub.f32 %v103_v12, %v3855_v5 }
  0xc3   :  { %5114 = vst [vmem:[#allocation181_spill] sm:$0xff] %v3797_v37  ;;  %832 = vmatpush.msrb.mxu0 %v3794_v38  ;;  %913 = vmatpush.msrb.mxu1 %v3843_v15  ;;  %v3879_v6 = vand.u32 4294901760, %v3848_v42  ;;  %v935_v60 = vsub.f32 %v3830_v32, %v3862_v22 }
  0xc4   :  { %5115 = vst [vmem:[#allocation182_spill] sm:$0xff] %v3802_v4  ;;  %1020 = vmatpush.msrb.mxu3 %v3708_v55  ;;  %984 = vmatpush.msrb.mxu2 %v3781_v44  ;;  %v1186_v44 = vsub.f32 %v3821_v36, %v3853_v31  ;;  %v3903_v12 = vand.u32 4294901760, %v3872_v14 }
  0xc5   :  { %5116 = vst [vmem:[#allocation183_spill] sm:$0xff] %v3806_v26  ;;  %v102_v26 = vld [vmem:[#allocation5 + $0x1d0] sm:$0xff]  ;;  %838 = vmatmul.f32.vlgmr.msrb.gmra.mxu0 %v837_v17  ;;  %919 = vmatpush.msrb.mxu1 %v3859_v46 }
  0xc6   :  { %5117 = vst [vmem:[#allocation184_spill] sm:$0xff] %v3811_v2  ;;  %1022 = vmatpush.msrb.mxu3 %v3726_v21  ;;  %v3881_v58 = vand.u32 4294901760, %v102_v26  ;;  %987 = vmatpush.msrb.mxu2 %v3802_v4  ;;  %v3900_v4 = vand.u32 4294901760, %v929_v53  ;;  %v3916_v53 = vand.u32 4294901760, %v1186_v44  ;;  %v1204_v44 = vsub.f32 %v3872_v14, %v3903_v12 }
  0xc7   :  { %5119 = vst [vmem:[#allocation185_spill] sm:$0xff] %v3821_v36  ;;  %1039 = vmatpush.msra.mxu0 %v3606_v9  ;;  %v99_v9 = vld [vmem:[#allocation5 + $0x1b8] sm:$0xff]  ;;  %925 = vmatpush.msrb.mxu1 %v3876_v61 }
  0xc8   :  { %5120 = vst [vmem:[#allocation186_spill] sm:$0xff] %v3825_v51  ;;  %v101_v51 = vld [vmem:[#allocation5 + $0x1c8] sm:$0xff]  ;;  %1024 = vmatpush.msrb.mxu3 %v3742_v34  ;;  %990 = vmatpush.msrb.mxu2 %v3830_v32  ;;  %v3910_v41 = vsub.f32 %v102_v26, %v3881_v58  ;;  %v3930_v25 = vand.u32 4294901760, %v99_v9 }
  0xc9   :  { %5121 = vst [vmem:[#allocation187_spill] sm:$0xff] %v3830_v32  ;;  %v3896_v17 = vand.u32 4294901760, %v101_v51  ;;  %1043 = vmatpush.msra.mxu0 %v3618_v11  ;;  %993 = vmatmul.f32.vlgmr.msrb.gmra.mxu2 %v3753_v63  ;;  %v3919_v32 = vand.u32 4294901760, %v3887_v56  ;;  %v98_v11 = vld [vmem:[#allocation5 + $0x1b0] sm:$0xff] }
  0xca   :  { %5122 = vst [vmem:[#allocation188_spill] sm:$0xff] %v3837_v23  ;;  %1026 = vmatpush.msrb.mxu3 %v3769_v45  ;;  %1143 = vmatpush.msra.mxu2 %v3786_v59  ;;  %v5140_v59 = vand.u32 4294901760, %v3753_v63  ;;  %v96_v63 = vld [vmem:[#allocation5 + $0x1a0] sm:$0xff] }
  0xcb   :  { %5123 = vst [vmem:[#allocation189_spill] sm:$0xff] %v3843_v15  ;;  %v3894_v15 = vand.u32 4294901760, %v3865_v0  ;;  %1047 = vmatpush.msra.mxu0 %v3635_v18  ;;  %v3928_v28 = vsub.f32 %v101_v51, %v3896_v17  ;;  %931 = vmatpush.msrb.mxu1 %v3900_v4  ;;  %v97_v18 = vld [vmem:[#allocation5 + $0x1a8] sm:$0xff] }
  0xcc   :  { %5124 = vst [vmem:[#allocation190_spill] sm:$0xff] %v3848_v42  ;;  %1028 = vmatpush.msrb.mxu3 %v3794_v38  ;;  %v3949_v38 = vand.u32 4294901760, %v98_v11  ;;  %1145 = vmatpush.msra.mxu2 %v3813_v48 }
  0xcd   :  { %5125 = vst [vmem:[#allocation191_spill] sm:$0xff] %v3853_v31  ;;  %v1198_v26 = vsub.f32 %v3865_v0, %v3894_v15  ;;  %1032 = vmatmul.f32.vlgmr.msrb.gmra.mxu3 %v5140_v59  ;;  %1051 = vmatpush.msra.mxu0 %v3649_v10  ;;  %v1210_v59 = vsub.f32 %v3887_v56, %v3919_v32 }
  0xce   :  { %5126 = vst [vmem:[#allocation192_spill] sm:$0xff] %v3859_v46  ;;  %v1192_v46 = vsub.f32 %v3848_v42, %v3879_v6  ;;  %1188 = vmatpush.msra.mxu3 %v3916_v53  ;;  %v3963_v10 = vsub.f32 %v99_v9, %v3930_v25  ;;  %1147 = vmatpush.msra.mxu2 %v3832_v13 }
  0xcf   :  { %5127 = vst [vmem:[#allocation193_spill] sm:$0xff] %v3865_v0  ;;  %1055 = vmatpush.msra.mxu0 %v3654_v39  ;;  %v3979_v9 = vsub.f32 %v98_v11, %v3949_v38 }
  0xd0   :  { %5128 = vst [vmem:[#allocation194_spill] sm:$0xff] %v3872_v14  ;;  %v3941_v51 = vand.u32 4294901760, %v1192_v46  ;;  %v3957_v46 = vand.u32 4294901760, %v1198_v26  ;;  %1149 = vmatpush.msra.mxu2 %v3839_v7 }
  0xd1   :  { %5129 = vst [vmem:[#allocation195_spill] sm:$0xff] %v3876_v61  ;;  %v3923_v61 = vand.u32 4294901760, %v935_v60  ;;  %v1487_v60 = vld [vmem:[#allocation2 + $0x8] sm:$0xff]  ;;  %1059 = vmatpush.msra.mxu0 %v3670_v19  ;;  %v94_v19 = vld [vmem:[#allocation5 + $0x190] sm:$0xff] }
  0xd2   :  { %5130 = vst [vmem:[#allocation196_spill] sm:$0xff] %v3879_v6  ;;  %v3936_v6 = vld.sshfl [vmem:[#allocation1 + $0x18] sm:$0xff pattern:$0x73625140]  ;;  %1194 = vmatpush.msra.mxu3 %v3941_v51  ;;  %1151 = vmatpush.msra.mxu2 %v3855_v5 }
  0xd3   :  { %5131 = vst [vmem:[#allocation197_spill] sm:$0xff] %v3887_v56  ;;  %937 = vmatpush.msrb.mxu1 %v3923_v61  ;;  %1063 = vmatpush.msra.mxu0 %v3695_v49  ;;  %v4015_v49 = vand.u32 4294901760, %v94_v19 }
  0xd4   :  { %5132 = vst [vmem:[#allocation198_spill] sm:$0xff] %v3894_v15  ;;  %v3944_v15 = vand.u32 4294901760, %v3910_v41  ;;  %939 = vmatmul.f32.vlgmr.msrb.gmra.mxu1 %v3720_v8  ;;  %1200 = vmatpush.msra.mxu3 %v3957_v46 }
  0xd5   :  { %5133 = vst [vmem:[#allocation199_spill] sm:$0xff] %v3900_v4  ;;  %v3947_v4 = vsub.f32 %v100_v50, %v3912_v35  ;;  %v3960_v50 = vand.u32 4294901760, %v3928_v28  ;;  %1106 = vmatpush.msra.mxu1 %v3573_v16  ;;  %v3992_v16 = vand.u32 4294901760, %v3963_v10  ;;  %1067 = vmatpush.msra.mxu0 %v3711_v33  ;;  %v92_v33 = vld [vmem:[#allocation5 + $0x180] sm:$0xff] }
  0xd6   :  { %5134 = vst [vmem:[#allocation200_spill] sm:$0xff] %v3903_v12  ;;  %v1216_v26 = vsub.f32 %v3910_v41, %v3944_v15  ;;  %1153 = vmatpush.msra.mxu2 %v3881_v58 }
  0xd7   :  { %5135 = vst [vmem:[#allocation201_spill] sm:$0xff] %v3910_v41  ;;  %v3976_v39 = vand.u32 4294901760, %v3947_v4  ;;  %1108 = vmatpush.msra.mxu1 %v3579_v27  ;;  %v4008_v27 = vand.u32 4294901760, %v3979_v9  ;;  %1071 = vmatpush.msra.mxu0 %v3729_v30  ;;  %v4048_v30 = vsub.f32 %v94_v19, %v4015_v49 }
  0xd8   :  { %5136 = vst [vmem:[#allocation202_spill] sm:$0xff] %v3916_v53  ;;  %v3969_v53 = vand.u32 4294901760, %v1204_v44  ;;  %v3985_v44 = vand.u32 4294901760, %v1210_v59  ;;  %v4003_v59 = vand.u32 4294901760, %v1216_v26  ;;  %1155 = vmatpush.msra.mxu2 %v3896_v17 }
  0xd9   :  { %5137 = vst [vmem:[#allocation203_spill] sm:$0xff] %v3919_v32  ;;  %v95_v32 = vld [vmem:[#allocation5 + $0x198] sm:$0xff]  ;;  %1110 = vmatpush.msra.mxu1 %v3585_v57  ;;  %1075 = vmatpush.msra.mxu0 %v3745_v29 }
  0xda   :  { %5138 = vst [vmem:[#allocation204_spill] sm:$0xff] %v3923_v61  ;;  %v3981_v61 = vand.u32 4294901760, %v96_v63  ;;  %1206 = vmatpush.msra.mxu3 %v3969_v53  ;;  %1157 = vmatpush.msra.mxu2 %v3912_v35 }
  0xdb   :  { %5139 = vst [vmem:[#allocation205_spill] sm:$0xff] %v3928_v28  ;;  %1112 = vmatpush.msra.mxu1 %v3594_v62  ;;  %1079 = vmatpush.msra.mxu0 %v3762_v52 }
  0xdc   :  { %5141 = vst [vmem:[#allocation206_spill] sm:$0xff] %v3941_v51  ;;  %v1222_v51 = vsub.f32 %v3928_v28, %v3960_v50  ;;  %1212 = vmatpush.msra.mxu3 %v3985_v44  ;;  %1159 = vmatpush.msra.mxu2 %v3930_v25 }
  0xdd   :  { %5142 = vst [vmem:[#allocation207_spill] sm:$0xff] %v3944_v15  ;;  %v3997_v15 = vand.u32 4294901760, %v95_v32  ;;  %1114 = vmatpush.msra.mxu1 %v3601_v1  ;;  %1083 = vmatpush.msra.mxu0 %v3778_v3 }
  0xde   :  { %5143 = vst [vmem:[#allocation208_spill] sm:$0xff] %v3947_v4  ;;  %v4019_v26 = vand.u32 4294901760, %v1222_v51  ;;  %1218 = vmatpush.msra.mxu3 %v4003_v59  ;;  %1161 = vmatpush.msra.mxu2 %v3949_v38 }
  0xdf   :  { %1489 = vst [vmem:[#allocation1] ss:$4 sm:$0xff] %v1487_v60  ;;  %v3965_v60 = vand.u32 4294901760, %v97_v18  ;;  %1116 = vmatpush.msra.mxu1 %v3613_v24  ;;  %1087 = vmatpush.msra.mxu0 %v3797_v37 }
  0xe0   :  { %5144 = vst [vmem:[#allocation209_spill] sm:$0xff] %v3957_v46  ;;  %v1228_v46 = vsub.f32 %v3947_v4, %v3976_v39  ;;  %1224 = vmatpush.msra.mxu3 %v4019_v26 }
  0xe1   :  { %5145 = vst [vmem:[#allocation210_spill] sm:$0xff] %v3960_v50  ;;  %v3995_v11 = vsub.f32 %v97_v18, %v3965_v60  ;;  %v4011_v18 = vsub.f32 %v96_v63, %v3981_v61  ;;  %v93_v50 = vld [vmem:[#allocation5 + $0x188] sm:$0xff]  ;;  %v4027_v63 = vsub.f32 %v95_v32, %v3997_v15  ;;  %v1240_v32 = vsub.f32 %v3979_v9, %v4008_v27 }
  0xe2   :  { %5146 = vst [vmem:[#allocation211_spill] sm:$0xff] %v3963_v10  ;;  %v4038_v51 = vand.u32 4294901760, %v1228_v46  ;;  %1118 = vmatpush.msra.mxu1 %v3632_v54  ;;  %1163 = vmatpush.msra.mxu2 %v3965_v60 }
  0xe3   :  { %5147 = vst [vmem:[#allocation212_spill] sm:$0xff] %v3969_v53  ;;  %v1234_v53 = vsub.f32 %v3963_v10, %v3992_v16  ;;  %v4024_v57 = vand.u32 4294901760, %v3995_v11  ;;  %v4043_v62 = vand.u32 4294901760, %v4011_v18  ;;  %v4059_v1 = vand.u32 4294901760, %v4027_v63  ;;  %1091 = vmatpush.msra.mxu0 %v3811_v2 }
  0xe4   :  { %5148 = vst [vmem:[#allocation213_spill] sm:$0xff] %v3976_v39  ;;  %v4031_v39 = vand.u32 4294901760, %v93_v50  ;;  %1230 = vmatpush.msra.mxu3 %v4038_v51  ;;  %1120 = vmatpush.msra.mxu1 %v3646_v47 }
  0xe5   :  { %5149 = vst [vmem:[#allocation214_spill] sm:$0xff] %v3979_v9  ;;  %v4054_v46 = vand.u32 4294901760, %v1234_v53  ;;  %v4072_v53 = vand.u32 4294901760, %v1240_v32  ;;  %v1258_v32 = vsub.f32 %v4027_v63, %v4059_v1  ;;  %1165 = vmatpush.msra.mxu2 %v3981_v61  ;;  %1095 = vmatpush.msra.mxu0 %v3837_v23 }
  0xe6   :  { %5150 = vst [vmem:[#allocation215_spill] sm:$0xff] %v3985_v44  ;;  %v4034_v44 = vand.u32 4294901760, %v3936_v6  ;;  %v4064_v19 = vsub.f32 %v93_v50, %v4031_v39  ;;  %v4079_v50 = vand.u32 4294901760, %v4048_v30  ;;  %1122 = vmatpush.msra.mxu1 %v3662_v20 }
  0xe7   :  { %5151 = vst [vmem:[#allocation216_spill] sm:$0xff] %v3992_v16  ;;  %v4050_v16 = vand.u32 4294901760, %v92_v33  ;;  %1236 = vmatpush.msra.mxu3 %v4054_v46  ;;  %1167 = vmatpush.msra.mxu2 %v3997_v15 }
  0xe8   :  { %5152 = vst [vmem:[#allocation217_spill] sm:$0xff] %v3995_v11  ;;  %v4068_v29 = vsub.f32 %v3936_v6, %v4034_v44  ;;  %v4093_v3 = vand.u32 4294901760, %v4064_v19  ;;  %1124 = vmatpush.msra.mxu1 %v3678_v40  ;;  %1099 = vmatpush.msra.mxu0 %v3862_v22 }
  0xe9   :  { %5153 = vst [vmem:[#allocation218_spill] sm:$0xff] %v4003_v59  ;;  %v1246_v59 = vsub.f32 %v3995_v11, %v4024_v57  ;;  %v4082_v52 = vsub.f32 %v92_v33, %v4050_v16  ;;  %1242 = vmatpush.msra.mxu3 %v4072_v53  ;;  %1169 = vmatpush.msra.mxu2 %v4015_v49 }
  0xea   :  { %5154 = vst [vmem:[#allocation219_spill] sm:$0xff] %v4008_v27  ;;  %v5171_v2 = vand.u32 4294901760, %v4068_v29  ;;  %1126 = vmatpush.msra.mxu1 %v3692_v43  ;;  %1101 = vmatmul.f32.vlgmr.msra.gmra.mxu0 %v3720_v8 }
  0xeb   :  { %5155 = vst [vmem:[#allocation220_spill] sm:$0xff] %v4011_v18  ;;  %v4086_v6 = vand.u32 4294901760, %v1246_v59  ;;  %v1264_v59 = vsub.f32 %v4048_v30, %v4079_v50  ;;  %v4105_v37 = vand.u32 4294901760, %v4082_v52  ;;  %1171 = vmatpush.msra.mxu2 %v4031_v39  ;;  %1286 = vmatpush.msrb.mxu0 %v3821_v36 }
  0xec   :  { %5156 = vst [vmem:[#allocation221_spill] sm:$0xff] %v4019_v26  ;;  %v1252_v26 = vsub.f32 %v4011_v18, %v4043_v62  ;;  %1128 = vmatpush.msra.mxu1 %v3708_v55 }
  0xed   :  { %5157 = vst [vmem:[#allocation222_spill] sm:$0xff] %v4024_v57  ;;  %1248 = vmatpush.msra.mxu3 %v4086_v6  ;;  %v1276_v23 = vsub.f32 %v4082_v52, %v4105_v37  ;;  %1173 = vmatpush.msra.mxu2 %v4050_v16 }
  0xee   :  { %5158 = vst [vmem:[#allocation223_spill] sm:$0xff] %v4027_v63  ;;  %v4098_v33 = vand.u32 4294901760, %v1252_v26  ;;  %v1270_v26 = vsub.f32 %v4064_v19, %v4093_v3  ;;  %1130 = vmatpush.msra.mxu1 %v3726_v21  ;;  %1289 = vmatpush.msrb.mxu0 %v3848_v42  ;;  %v5266_v42 = vld [vmem:[#allocation127_spill] sm:$0xff] }
  0xef   :  { %5159 = vst [vmem:[#allocation224_spill] sm:$0xff] %v4038_v51  ;;  %v4109_v51 = vand.u32 4294901760, %v1258_v32  ;;  %v4122_v32 = vand.u32 4294901760, %v1264_v59  ;;  %v4136_v59 = vand.u32 4294901760, %v1276_v23  ;;  %1380 = vmatpush.msrb.mxu2 %v3853_v31  ;;  %v5175_v23 = vld [vmem:[#allocation196_spill] sm:$0xff] }
  0xf0   :  { %5160 = vst [vmem:[#allocation225_spill] sm:$0xff] %v4043_v62  ;;  %1254 = vmatpush.msra.mxu3 %v4098_v33  ;;  %1132 = vmatpush.msra.mxu1 %v3742_v34  ;;  %v5252_v31 = vld [vmem:[#allocation48_spill] sm:$0xff] }
  0xf1   :  { %5161 = vst [vmem:[#allocation226_spill] sm:$0xff] %v4048_v30  ;;  %1292 = vmatpush.msrb.mxu0 %v3865_v0  ;;  %1384 = vmatpush.msrb.mxu2 %v5175_v23  ;;  %v5179_v23 = vld [vmem:[#allocation203_spill] sm:$0xff] }
  0xf2   :  { %5162 = vst [vmem:[#allocation227_spill] sm:$0xff] %v4050_v16  ;;  %1260 = vmatpush.msra.mxu3 %v4109_v51  ;;  %1134 = vmatpush.msra.mxu1 %v3769_v45  ;;  %v5255_v0 = vld [vmem:[#allocation51_spill] sm:$0xff] }
  0xf3   :  { %5163 = vst [vmem:[#allocation228_spill] sm:$0xff] %v4059_v1  ;;  %1295 = vmatpush.msrb.mxu0 %v3872_v14  ;;  %v1490_v14 = vld.sshfl [vmem:[#allocation1] sm:$0xff pattern:$0x73625140] }
  0xf4   :  { %5164 = vst [vmem:[#allocation229_spill] sm:$0xff] %v4064_v19  ;;  %1266 = vmatpush.msra.mxu3 %v4122_v32 }
  0xf5   :  { %5165 = vst [vmem:[#allocation230_spill] sm:$0xff] %v4072_v53  ;;  %v1177_v53 = vsub.f32 %v4068_v29, %v5171_v2  ;;  %v4130_v2 = vand.u32 4294901760, %v1270_v26  ;;  %v5177_v26 = vld [vmem:[#allocation180_spill] sm:$0xff]  ;;  %1298 = vmatpush.msrb.mxu0 %v3887_v56  ;;  %v5235_v56 = vld [vmem:[#allocation93_spill] sm:$0xff] }
  0xf6   :  { %5166 = vst [vmem:[#allocation231_spill] sm:$0xff] %v4079_v50  ;;  %1136 = vmatpush.msra.mxu1 %v5177_v26 }
  0xf7   :  { %5167 = vst [vmem:[#allocation232_spill] sm:$0xff] %v4082_v52  ;;  %1272 = vmatpush.msra.mxu3 %v4130_v2  ;;  %1138 = vmatmul.f32.vlgmr.msra.gmra.mxu1 %v3720_v8  ;;  %v5180_v8 = vld [vmem:[#allocation207_spill] sm:$0xff] }
  0xf8   :  { %5168 = vst [vmem:[#allocation233_spill] sm:$0xff] %v4093_v3  ;;  %1301 = vmatpush.msrb.mxu0 %v3910_v41  ;;  %v5229_v41 = vld [vmem:[#allocation84_spill] sm:$0xff] }
  0xf9   :  { %5169 = vst [vmem:[#allocation234_spill] sm:$0xff] %v4098_v33  ;;  %v1178_v33 = vand.u32 4294901760, %v1177_v53  ;;  %1278 = vmatpush.msra.mxu3 %v4136_v59  ;;  %v5176_v53 = vld [vmem:[#allocation178_spill] sm:$0xff] }
  0xfa   :  { %5170 = vst [vmem:[#allocation235_spill] sm:$0xff] %v4105_v37  ;;  %1280 = vmatmul.f32.vlgmr.msra.gmra.mxu3 %v4034_v44  ;;  %1339 = vmatpush.msrb.mxu1 %v5176_v53 }
  0xfb   :  { %5172 = vst [vmem:[#allocation236_spill] sm:$0xff] %v4122_v32  ;;  %1179 = vmatmul.f32.vlgmr.msra.gmra.mxu2 %v1178_v33  ;;  %1447 = vmatpush.msrb.mxu3 %v5176_v53  ;;  %v5178_v33 = vld [vmem:[#allocation198_spill] sm:$0xff]  ;;  %v5272_v32 = vld [vmem:[#allocation132_spill] sm:$0xff] }
  0xfc   :  { %5173 = vst [vmem:[#allocation237_spill] sm:$0xff] %v4130_v2  ;;  %1388 = vmatpush.msrb.mxu2 %v5178_v33  ;;  %1341 = vmatpush.msrb.mxu1 %v3813_v48  ;;  %v5232_v33 = vld [vmem:[#allocation88_spill] sm:$0xff]  ;;  %v5261_v2 = vld [vmem:[#allocation61_spill] sm:$0xff] }
  0xfd   :  { %5174 = vst [vmem:[#allocation238_spill] sm:$0xff] %v4136_v59  ;;  %1449 = vmatpush.msrb.mxu3 %v3813_v48  ;;  %1304 = vmatpush.msrb.mxu0 %v3928_v28  ;;  %v5226_v28 = vld [vmem:[#allocation80_spill] sm:$0xff]  ;;  %v5245_v59 = vld [vmem:[#allocation102_spill] sm:$0xff] }
  0xfe   :  { %1392 = vmatpush.msrb.mxu2 %v3903_v12  ;;  %1343 = vmatpush.msrb.mxu1 %v3832_v13  ;;  %v5181_v12 = vld [vmem:[#allocation210_spill] sm:$0xff] }
  0xff   :  { %1451 = vmatpush.msrb.mxu3 %v3832_v13  ;;  %1307 = vmatpush.msrb.mxu0 %v3947_v4  ;;  %v5223_v4 = vld [vmem:[#allocation73_spill] sm:$0xff] }
 0x100   :  { %1396 = vmatpush.msrb.mxu2 %v5179_v23  ;;  %1345 = vmatpush.msrb.mxu1 %v3839_v7  ;;  %v5182_v23 = vld [vmem:[#allocation213_spill] sm:$0xff] }
 0x101   :  { %1453 = vmatpush.msrb.mxu3 %v3839_v7  ;;  %1310 = vmatpush.msrb.mxu0 %v3963_v10  ;;  %v5220_v10 = vld [vmem:[#allocation70_spill] sm:$0xff] }
 0x102   :  { %1400 = vmatpush.msrb.mxu2 %v5180_v8  ;;  %1347 = vmatpush.msrb.mxu1 %v3855_v5  ;;  %v5183_v8 = vld [vmem:[#allocation216_spill] sm:$0xff] }
 0x103   :  { %1455 = vmatpush.msrb.mxu3 %v3855_v5  ;;  %1313 = vmatpush.msrb.mxu0 %v3979_v9  ;;  %v5214_v9 = vld [vmem:[#allocation60_spill] sm:$0xff] }
 0x104   :  { %1404 = vmatpush.msrb.mxu2 %v5181_v12  ;;  %1349 = vmatpush.msrb.mxu1 %v3881_v58  ;;  %v5217_v12 = vld [vmem:[#allocation64_spill] sm:$0xff] }
 0x105   :  { %1457 = vmatpush.msrb.mxu3 %v3881_v58  ;;  %1316 = vmatpush.msrb.mxu0 %v3995_v11  ;;  %v5208_v11 = vld [vmem:[#allocation49_spill] sm:$0xff] }
 0x106   :  { %1408 = vmatpush.msrb.mxu2 %v5182_v23  ;;  %1351 = vmatpush.msrb.mxu1 %v3896_v17  ;;  %v5211_v23 = vld [vmem:[#allocation55_spill] sm:$0xff] }
 0x107   :  { %1459 = vmatpush.msrb.mxu3 %v3896_v17  ;;  %1319 = vmatpush.msrb.mxu0 %v4011_v18  ;;  %v5198_v18 = vld [vmem:[#allocation22_spill] sm:$0xff] }
 0x108   :  { %1412 = vmatpush.msrb.mxu2 %v5183_v8  ;;  %1353 = vmatpush.msrb.mxu1 %v3912_v35  ;;  %v5205_v8 = vld [vmem:[#allocation46_spill] sm:$0xff] }
 0x109   :  { %1461 = vmatpush.msrb.mxu3 %v3912_v35  ;;  %1322 = vmatpush.msrb.mxu0 %v4027_v63  ;;  %v5195_v63 = vld [vmem:[#allocation21_spill] sm:$0xff] }
 0x10a   :  { %1416 = vmatpush.msrb.mxu2 %v4008_v27  ;;  %1355 = vmatpush.msrb.mxu1 %v3930_v25  ;;  %v5197_v27 = vld [vmem:[#allocation20_spill] sm:$0xff] }
 0x10b   :  { %1463 = vmatpush.msrb.mxu3 %v3930_v25  ;;  %1325 = vmatpush.msrb.mxu0 %v4048_v30  ;;  %v5191_v30 = vand.u32 4294901760, %v4068_v29 }
 0x10c   :  { %1420 = vmatpush.msrb.mxu2 %v4024_v57  ;;  %1357 = vmatpush.msrb.mxu1 %v3949_v38  ;;  %v5193_v57 = vld [vmem:[#allocation34_spill] sm:$0xff] }
 0x10d   :  { %1465 = vmatpush.msrb.mxu3 %v3949_v38  ;;  %1328 = vmatpush.msrb.mxu0 %v4064_v19  ;;  %v5190_v19 = vld [vmem:[#allocation15_spill] sm:$0xff] }
 0x10e   :  { %1424 = vmatpush.msrb.mxu2 %v4043_v62  ;;  %1359 = vmatpush.msrb.mxu1 %v3965_v60  ;;  %v5184_v62 = vld [vmem:[#allocation11_spill] sm:$0xff] }
 0x10f   :  { %1467 = vmatpush.msrb.mxu3 %v3965_v60  ;;  %1331 = vmatpush.msrb.mxu0 %v4082_v52  ;;  %v5187_v52 = vld [vmem:[#allocation17_spill] sm:$0xff] }
 0x110   :  { %1428 = vmatpush.msrb.mxu2 %v4059_v1  ;;  %1361 = vmatpush.msrb.mxu1 %v3981_v61  ;;  %v5185_v1 = vld [vmem:[#allocation12_spill] sm:$0xff] }
 0x111   :  { %1469 = vmatpush.msrb.mxu3 %v3981_v61  ;;  %1334 = vmatmul.f32.vlgmr.msrb.gmra.mxu0 %v4068_v29  ;;  %v5199_v29 = vld [vmem:[#allocation38_spill] sm:$0xff] }
 0x112   :  { %1432 = vmatpush.msrb.mxu2 %v4079_v50  ;;  %1499 = vmatpush.msra.mxu0 %v5184_v62  ;;  %v5186_v50 = vld [vmem:[#allocation13_spill] sm:$0xff] }
 0x113   :  { %1471 = vmatpush.msrb.mxu3 %v3997_v15  ;;  %1363 = vmatpush.msrb.mxu1 %v3997_v15 }
 0x114   :  { %1436 = vmatpush.msrb.mxu2 %v4093_v3  ;;  %1501 = vmatpush.msra.mxu0 %v5185_v1  ;;  %v5188_v3 = vld [vmem:[#allocation14_spill] sm:$0xff] }
 0x115   :  { %1473 = vmatpush.msrb.mxu3 %v4015_v49  ;;  %1365 = vmatpush.msrb.mxu1 %v4015_v49 }
 0x116   :  { %1440 = vmatpush.msrb.mxu2 %v4105_v37  ;;  %1503 = vmatpush.msra.mxu0 %v5186_v50  ;;  %v5189_v37 = vld [vmem:[#allocation18_spill] sm:$0xff] }
 0x117   :  { %1475 = vmatpush.msrb.mxu3 %v4031_v39  ;;  %1442 = vmatmul.f32.vlgmr.msrb.gmra.mxu2 %v4034_v44 }
 0x118   :  { %1642 = vmatpush.msra.mxu2 %v5187_v52  ;;  %1367 = vmatpush.msrb.mxu1 %v4031_v39  ;;  %v5192_v52 = vld [vmem:[#allocation19_spill] sm:$0xff] }
 0x119   :  { %1477 = vmatpush.msrb.mxu3 %v4050_v16  ;;  %1505 = vmatpush.msra.mxu0 %v5188_v3 }
 0x11a   :  { %1479 = vmatmul.f32.vlgmr.msrb.gmra.mxu3 %v4034_v44  ;;  %1645 = vmatpush.msra.mxu2 %v5189_v37  ;;  %v5194_v44 = vld [vmem:[#allocation16_spill] sm:$0xff]  ;;  %v5196_v37 = vld [vmem:[#allocation35_spill] sm:$0xff] }
 0x11b   :  { %1695 = vmatpush.msra.mxu3 %v5184_v62  ;;  %1369 = vmatpush.msrb.mxu1 %v4050_v16  ;;  %v5271_v16 = vld [vmem:[#allocation112_spill] sm:$0xff] }
 0x11c   :  { %1507 = vmatpush.msra.mxu0 %v5190_v19  ;;  %1373 = vmatmul.f32.vlgmr.msrb.gmra.mxu1 %v5191_v30  ;;  %v5200_v30 = vld [vmem:[#allocation27_spill] sm:$0xff] }
 0x11d   :  { %1648 = vmatpush.msra.mxu2 %v5192_v52  ;;  %1544 = vmatpush.msra.mxu1 %v5193_v57  ;;  %v5201_v57 = vld [vmem:[#allocation23_spill] sm:$0xff]  ;;  %v5202_v52 = vld [vmem:[#allocation41_spill] sm:$0xff] }
 0x11e   :  { %1697 = vmatpush.msra.mxu3 %v5185_v1  ;;  %1509 = vmatpush.msra.mxu0 %v5194_v44 }
 0x11f   :  { %1651 = vmatpush.msra.mxu2 %v5195_v63  ;;  %1550 = vmatpush.msra.mxu1 %v5196_v37  ;;  %v5203_v63 = vld [vmem:[#allocation29_spill] sm:$0xff]  ;;  %v5204_v37 = vld [vmem:[#allocation30_spill] sm:$0xff] }
 0x120   :  { %1699 = vmatpush.msra.mxu3 %v5186_v50  ;;  %1511 = vmatpush.msra.mxu0 %v5197_v27 }
 0x121   :  { %1654 = vmatpush.msra.mxu2 %v5198_v18  ;;  %1556 = vmatpush.msra.mxu1 %v5199_v29  ;;  %v5206_v18 = vld [vmem:[#allocation32_spill] sm:$0xff] }
 0x122   :  { %1701 = vmatpush.msra.mxu3 %v5188_v3  ;;  %1513 = vmatpush.msra.mxu0 %v5200_v30  ;;  %v5207_v29 = vld [vmem:[#allocation36_spill] sm:$0xff] }
 0x123   :  { %1657 = vmatpush.msra.mxu2 %v5201_v57  ;;  %1562 = vmatpush.msra.mxu1 %v5202_v52  ;;  %v5209_v57 = vld [vmem:[#allocation37_spill] sm:$0xff]  ;;  %v5210_v52 = vld [vmem:[#allocation40_spill] sm:$0xff] }
 0x124   :  { %1703 = vmatpush.msra.mxu3 %v5190_v19  ;;  %1515 = vmatpush.msra.mxu0 %v5203_v63 }
 0x125   :  { %1660 = vmatpush.msra.mxu2 %v5204_v37  ;;  %1568 = vmatpush.msra.mxu1 %v5205_v8  ;;  %v5212_v37 = vld [vmem:[#allocation42_spill] sm:$0xff]  ;;  %v5213_v8 = vld [vmem:[#allocation44_spill] sm:$0xff] }
 0x126   :  { %1705 = vmatpush.msra.mxu3 %v5194_v44  ;;  %1517 = vmatpush.msra.mxu0 %v5206_v18 }
 0x127   :  { %1663 = vmatpush.msra.mxu2 %v5207_v29  ;;  %1574 = vmatpush.msra.mxu1 %v5208_v11  ;;  %v5215_v29 = vld [vmem:[#allocation47_spill] sm:$0xff]  ;;  %v5216_v11 = vld [vmem:[#allocation45_spill] sm:$0xff] }
 0x128   :  { %1707 = vmatpush.msra.mxu3 %v5197_v27  ;;  %1519 = vmatpush.msra.mxu0 %v5209_v57 }
 0x129   :  { %1666 = vmatpush.msra.mxu2 %v5210_v52  ;;  %1580 = vmatpush.msra.mxu1 %v5211_v23  ;;  %v5218_v52 = vld [vmem:[#allocation50_spill] sm:$0xff]  ;;  %v5219_v23 = vld [vmem:[#allocation52_spill] sm:$0xff] }
 0x12a   :  { %1709 = vmatpush.msra.mxu3 %v5200_v30  ;;  %1521 = vmatpush.msra.mxu0 %v5212_v37 }
 0x12b   :  { %1669 = vmatpush.msra.mxu2 %v5213_v8  ;;  %1586 = vmatpush.msra.mxu1 %v5214_v9  ;;  %v5221_v8 = vld [vmem:[#allocation56_spill] sm:$0xff]  ;;  %v5222_v9 = vld [vmem:[#allocation57_spill] sm:$0xff] }
 0x12c   :  { %1711 = vmatpush.msra.mxu3 %v5203_v63  ;;  %1523 = vmatpush.msra.mxu0 %v5215_v29 }
 0x12d   :  { %1672 = vmatpush.msra.mxu2 %v5216_v11  ;;  %1592 = vmatpush.msra.mxu1 %v5217_v12  ;;  %v5224_v11 = vld [vmem:[#allocation58_spill] sm:$0xff] }
 0x12e   :  { %1713 = vmatpush.msra.mxu3 %v5206_v18  ;;  %1525 = vmatpush.msra.mxu0 %v5218_v52  ;;  %v5225_v12 = vld [vmem:[#allocation62_spill] sm:$0xff] }
 0x12f   :  { %1675 = vmatpush.msra.mxu2 %v5219_v23  ;;  %1598 = vmatpush.msra.mxu1 %v5220_v10  ;;  %v5227_v23 = vld [vmem:[#allocation24_spill] sm:$0xff]  ;;  %v5228_v10 = vld [vmem:[#allocation66_spill] sm:$0xff] }
 0x130   :  { %1715 = vmatpush.msra.mxu3 %v5209_v57  ;;  %1527 = vmatpush.msra.mxu0 %v5221_v8 }
 0x131   :  { %1678 = vmatpush.msra.mxu2 %v5222_v9  ;;  %1604 = vmatpush.msra.mxu1 %v5223_v4  ;;  %v5230_v9 = vld [vmem:[#allocation25_spill] sm:$0xff]  ;;  %v5231_v4 = vld [vmem:[#allocation68_spill] sm:$0xff] }
 0x132   :  { %1717 = vmatpush.msra.mxu3 %v5212_v37  ;;  %1529 = vmatpush.msra.mxu0 %v5224_v11 }
 0x133   :  { %1681 = vmatpush.msra.mxu2 %v5225_v12  ;;  %1610 = vmatpush.msra.mxu1 %v5226_v28  ;;  %v5233_v12 = vld [vmem:[#allocation26_spill] sm:$0xff] }
 0x134   :  { %1719 = vmatpush.msra.mxu3 %v5215_v29  ;;  %1736 = vmatpush.msrb.mxu0 %v5227_v23  ;;  %v5234_v28 = vld [vmem:[#allocation54_spill] sm:$0xff]  ;;  %v5236_v23 = vld [vmem:[#allocation28_spill] sm:$0xff] }
 0x135   :  { %1684 = vmatpush.msra.mxu2 %v5228_v10  ;;  %1616 = vmatpush.msra.mxu1 %v5229_v41  ;;  %v5237_v41 = vld [vmem:[#allocation59_spill] sm:$0xff] }
 0x136   :  { %1721 = vmatpush.msra.mxu3 %v5218_v52  ;;  %1740 = vmatpush.msrb.mxu0 %v5230_v9  ;;  %v5238_v10 = vld [vmem:[#allocation91_spill] sm:$0xff]  ;;  %v5239_v9 = vld [vmem:[#allocation98_spill] sm:$0xff] }
 0x137   :  { %1687 = vmatpush.msra.mxu2 %v5231_v4  ;;  %1622 = vmatpush.msra.mxu1 %v5232_v33  ;;  %v5240_v4 = vld [vmem:[#allocation31_spill] sm:$0xff] }
 0x138   :  { %1723 = vmatpush.msra.mxu3 %v5221_v8  ;;  %1744 = vmatpush.msrb.mxu0 %v5233_v12  ;;  %v5241_v33 = vld [vmem:[#allocation67_spill] sm:$0xff]  ;;  %v5242_v12 = vld [vmem:[#allocation96_spill] sm:$0xff] }
 0x139   :  { %1840 = vmatpush.msrb.mxu2 %v5234_v28  ;;  %1628 = vmatpush.msra.mxu1 %v5235_v56  ;;  %v5243_v56 = vld [vmem:[#allocation33_spill] sm:$0xff] }
 0x13a   :  { %1725 = vmatpush.msra.mxu3 %v5224_v11  ;;  %1748 = vmatpush.msrb.mxu0 %v5236_v23  ;;  %v5244_v23 = vld [vmem:[#allocation72_spill] sm:$0xff] }
 0x13b   :  { %1842 = vmatpush.msrb.mxu2 %v5237_v41  ;;  %1634 = vmatpush.msra.mxu1 %v5239_v9  ;;  %v4294_v9 = vand.u32 4294901760, %v1490_v14 }
 0x13c   :  { %1885 = vmatpush.msrb.mxu3 %v5238_v10  ;;  %1752 = vmatpush.msrb.mxu0 %v5240_v4  ;;  %v5246_v10 = vld [vmem:[#allocation39_spill] sm:$0xff]  ;;  %v5248_v4 = vld [vmem:[#allocation106_spill] sm:$0xff] }
 0x13d   :  { %1803 = vmatpush.msrb.mxu1 %v5184_v62  ;;  %1844 = vmatpush.msrb.mxu2 %v5241_v33  ;;  %v5247_v62 = vld [vmem:[#allocation77_spill] sm:$0xff] }
 0x13e   :  { %1891 = vmatpush.msrb.mxu3 %v5242_v12  ;;  %1756 = vmatpush.msrb.mxu0 %v5243_v56  ;;  %v5249_v12 = vld [vmem:[#allocation43_spill] sm:$0xff]  ;;  %v5250_v56 = vld [vmem:[#allocation82_spill] sm:$0xff] }
 0x13f   :  { %1805 = vmatpush.msrb.mxu1 %v5185_v1  ;;  %1846 = vmatpush.msrb.mxu2 %v5244_v23  ;;  %v5251_v1 = vld [vmem:[#allocation109_spill] sm:$0xff] }
 0x140   :  { %1897 = vmatpush.msrb.mxu3 %v5245_v59  ;;  %1760 = vmatpush.msrb.mxu0 %v5246_v10  ;;  %v5253_v59 = vld [vmem:[#allocation83_spill] sm:$0xff]  ;;  %v5254_v10 = vld [vmem:[#allocation113_spill] sm:$0xff] }
 0x141   :  { %1807 = vmatpush.msrb.mxu1 %v5186_v50  ;;  %1848 = vmatpush.msrb.mxu2 %v5247_v62  ;;  %v1531_v50 = vsub.f32 %v1490_v14, %v4294_v9  ;;  %v5260_v14 = vld [vmem:[#allocation120_spill] sm:$0xff] }
 0x142   :  { %1903 = vmatpush.msrb.mxu3 %v5248_v4  ;;  %1764 = vmatpush.msrb.mxu0 %v5249_v12  ;;  %v5256_v4 = vld [vmem:[#allocation87_spill] sm:$0xff]  ;;  %v5258_v12 = vld [vmem:[#allocation53_spill] sm:$0xff] }
 0x143   :  { %1809 = vmatpush.msrb.mxu1 %v5188_v3  ;;  %1850 = vmatpush.msrb.mxu2 %v5250_v56  ;;  %v5257_v3 = vld [vmem:[#allocation116_spill] sm:$0xff] }
 0x144   :  { %1909 = vmatpush.msrb.mxu3 %v5251_v1  ;;  %1768 = vmatpush.msrb.mxu0 %v5252_v31  ;;  %v1532_v31 = vand.u32 4294901760, %v1531_v50  ;;  %v1491_v1 = vld.sshfl [vmem:[#allocation1 + $0x8] sm:$0xff pattern:$0x73625140] }
 0x145   :  { %1811 = vmatpush.msrb.mxu1 %v5190_v19  ;;  %1852 = vmatpush.msrb.mxu2 %v5253_v59  ;;  %v5259_v19 = vld [vmem:[#allocation95_spill] sm:$0xff] }
 0x146   :  { %1915 = vmatpush.msrb.mxu3 %v5254_v10  ;;  %1772 = vmatpush.msrb.mxu0 %v5255_v0  ;;  %v5262_v0 = vld [vmem:[#allocation100_spill] sm:$0xff]  ;;  %v5264_v10 = vld [vmem:[#allocation65_spill] sm:$0xff] }
 0x147   :  { %1813 = vmatpush.msrb.mxu1 %v5194_v44  ;;  %1854 = vmatpush.msrb.mxu2 %v5256_v4  ;;  %v5263_v44 = vld [vmem:[#allocation123_spill] sm:$0xff] }
 0x148   :  { %1921 = vmatpush.msrb.mxu3 %v5257_v3  ;;  %1776 = vmatpush.msrb.mxu0 %v5258_v12  ;;  %v1533_v3 = vsub.f32 %v1531_v50, %v1532_v31  ;;  %v5265_v12 = vld [vmem:[#allocation104_spill] sm:$0xff] }
 0x149   :  { %1815 = vmatpush.msrb.mxu1 %v5197_v27  ;;  %1856 = vmatpush.msrb.mxu2 %v5259_v19  ;;  %v4321_v27 = vand.u32 4294901760, %v1491_v1 }
 0x14a   :  { %1927 = vmatpush.msrb.mxu3 %v5260_v14  ;;  %1780 = vmatpush.msrb.mxu0 %v5261_v2  ;;  %v5267_v14 = vld [vmem:[#allocation71_spill] sm:$0xff]  ;;  %v5268_v2 = vld [vmem:[#allocation108_spill] sm:$0xff] }
 0x14b   :  { %1817 = vmatpush.msrb.mxu1 %v5200_v30  ;;  %1858 = vmatpush.msrb.mxu2 %v5262_v0  ;;  %v5269_v30 = vld [vmem:[#allocation129_spill] sm:$0xff] }
 0x14c   :  { %1933 = vmatpush.msrb.mxu3 %v5263_v44  ;;  %1784 = vmatpush.msrb.mxu0 %v5264_v10  ;;  %v5270_v44 = vld [vmem:[#allocation75_spill] sm:$0xff]  ;;  %v4332_v10 = vsub.f32 %v1491_v1, %v4321_v27  ;;  %v5277_v1 = vld [vmem:[#allocation122_spill] sm:$0xff] }
 0x14d   :  { %1819 = vmatpush.msrb.mxu1 %v5203_v63  ;;  %1860 = vmatpush.msrb.mxu2 %v5265_v12  ;;  %v1534_v63 = vand.u32 4294901760, %v1533_v3  ;;  %v5276_v3 = vld [vmem:[#allocation63_spill] sm:$0xff] }
 0x14e   :  { %1939 = vmatpush.msrb.mxu3 %v5266_v42  ;;  %1788 = vmatpush.msrb.mxu0 %v5267_v14  ;;  %v5273_v42 = vld [vmem:[#allocation78_spill] sm:$0xff] }
 0x14f   :  { %1821 = vmatpush.msrb.mxu1 %v5206_v18  ;;  %1862 = vmatpush.msrb.mxu2 %v5268_v2  ;;  %v5274_v18 = vld [vmem:[#allocation118_spill] sm:$0xff] }
 0x150   :  { %1945 = vmatpush.msrb.mxu3 %v5269_v30  ;;  %1792 = vmatpush.msrb.mxu0 %v5270_v44  ;;  %v5275_v14 = vld [vmem:[#allocation134_spill] sm:$0xff]  ;;  %v5278_v30 = vld [vmem:[#allocation136_spill] sm:$0xff]  ;;  %v5279_v44 = vld [vmem:[#allocation69_spill] sm:$0xff] }
 0x151   :  { %1823 = vmatpush.msrb.mxu1 %v5209_v57  ;;  %1864 = vmatpush.msrb.mxu2 %v5271_v16  ;;  %v1873_v57 = vand.u32 4294901760, %v4332_v10 }
 0x152   :  { %1951 = vmatpush.msrb.mxu3 %v5272_v32  ;;  %1796 = vmatpush.msrb.mxu0 %v5273_v42  ;;  %v258_v32 = vpop.f32.mrf.mxu1  ;;  %v5281_v42 = vld [vmem:[#allocation137_spill] sm:$0xff] }
 0x153   :  { %1825 = vmatpush.msrb.mxu1 %v5212_v37  ;;  %1866 = vmatpush.msrb.mxu2 %v5274_v18  ;;  %v5280_v37 = vld [vmem:[#allocation126_spill] sm:$0xff] }
 0x154   :  { %1957 = vmatpush.msrb.mxu3 %v5275_v14  ;;  %1535 = vmatmul.f32.vlgmr.msra.gmra.mxu0 %v1534_v63  ;;  %v157_v63 = vpop.f32.mrf.mxu0  ;;  %v5282_v14 = vld [vmem:[#allocation76_spill] sm:$0xff] }
 0x155   :  { %1827 = vmatpush.msrb.mxu1 %v5215_v29  ;;  %1983 = vmatpush.msra.mxu0 %v5276_v3  ;;  %v1874_v29 = vsub.f32 %v4332_v10, %v1873_v57  ;;  %v259_v3 = vadd.f32 %v258_v32, %v157_v63  ;;  %v5287_v32 = vld [vmem:[#allocation86_spill] sm:$0xff]  ;;  %v5288_v63 = vld [vmem:[#allocation85_spill] sm:$0xff] }
 0x156   :  { %1868 = vmatpush.msrb.mxu2 %v5277_v1  ;;  %1963 = vmatpush.msrb.mxu3 %v5278_v30  ;;  %v5283_v30 = vld [vmem:[#allocation74_spill] sm:$0xff] }
 0x157   :  { %1690 = vmatmul.f32.vlgmr.msra.gmra.mxu2 %v1531_v50  ;;  %1986 = vmatpush.msra.mxu0 %v5279_v44  ;;  %v312_v50 = vpop.f32.mrf.mxu2  ;;  %v5284_v44 = vld [vmem:[#allocation138_spill] sm:$0xff]  ;;  %v1875_v36 = vand.u32 4294901760, %v1874_v29  ;;  %v5290_v29 = vld [vmem:[#allocation89_spill] sm:$0xff] }
 0x158   :  { %1829 = vmatpush.msrb.mxu1 %v5218_v52  ;;  %1870 = vmatpush.msrb.mxu2 %v5280_v37  ;;  %v5285_v52 = vld [vmem:[#allocation81_spill] sm:$0xff] }
 0x159   :  { %1969 = vmatpush.msrb.mxu3 %v5281_v42  ;;  %1989 = vmatpush.msra.mxu0 %v5282_v14  ;;  %v5286_v42 = vld [vmem:[#allocation79_spill] sm:$0xff]  ;;  %v5289_v14 = vld [vmem:[#allocation90_spill] sm:$0xff] }
 0x15a   :  { %1729 = vmatmul.f32.vlgmr.msra.gmra.mxu3 %v1532_v31  ;;  %2077 = vmatpush.msra.mxu2 %v5283_v30  ;;  %v313_v31 = vadd.f32 %v312_v50, %v259_v3  ;;  %v5292_v3 = vld [vmem:[#allocation94_spill] sm:$0xff]  ;;  %v457_v50 = vpop.f32.mrf.mxu1 }
 0x15b   :  { %1831 = vmatpush.msrb.mxu1 %v5221_v8  ;;  %1975 = vmatpush.msrb.mxu3 %v5284_v44  ;;  %v351_v8 = vpop.f32.mrf.mxu3  ;;  %v5294_v44 = vld [vmem:[#allocation99_spill] sm:$0xff] }
 0x15c   :  { %1636 = vmatmul.f32.vlgmr.msra.gmra.mxu1 %v4294_v9  ;;  %1992 = vmatpush.msra.mxu0 %v5285_v52  ;;  %v352_v30 = vadd.f32 %v351_v8, %v313_v31  ;;  %v5295_v52 = vld [vmem:[#allocation103_spill] sm:$0xff]  ;;  %v5300_v8 = vld [vmem:[#allocation110_spill] sm:$0xff] }
 0x15d   :  { %2081 = vmatpush.msra.mxu2 %v5286_v42  ;;  %2144 = vmatpush.msra.mxu3 %v5234_v28 }
 0x15e   :  { %1833 = vmatpush.msrb.mxu1 %v5224_v11  ;;  %1995 = vmatpush.msra.mxu0 %v5287_v32  ;;  %v420_v11 = vpop.f32.mrf.mxu0  ;;  %v5299_v32 = vld [vmem:[#allocation111_spill] sm:$0xff] }
 0x15f   :  { %2085 = vmatpush.msra.mxu2 %v5288_v63  ;;  %2146 = vmatpush.msra.mxu3 %v5237_v41  ;;  %v498_v31 = vpop.f32.mrf.mxu2  ;;  %v5301_v63 = vld [vmem:[#allocation115_spill] sm:$0xff] }
 0x160   :  { %2036 = vmatpush.msra.mxu1 %v5234_v28  ;;  %1876 = vmatmul.f32.vlgmr.msrb.gmra.mxu2 %v1875_v36  ;;  %v5291_v28 = vld [vmem:[#allocation92_spill] sm:$0xff]  ;;  %v421_v36 = vadd.f32 %v420_v11, %v352_v30 }
 0x161   :  { %1998 = vmatpush.msra.mxu0 %v5289_v14  ;;  %2089 = vmatpush.msra.mxu2 %v5290_v29  ;;  %v5303_v29 = vld [vmem:[#allocation119_spill] sm:$0xff] }
 0x162   :  { %2038 = vmatpush.msra.mxu1 %v5237_v41  ;;  %2148 = vmatpush.msra.mxu3 %v5241_v33  ;;  %v5293_v41 = vld [vmem:[#allocation97_spill] sm:$0xff]  ;;  %v458_v42 = vadd.f32 %v457_v50, %v421_v36 }
 0x163   :  { %1798 = vmatmul.f32.vlgmr.msrb.gmra.mxu0 %v4294_v9  ;;  %1977 = vmatmul.f32.vlgmr.msrb.gmra.mxu3 %v4321_v27  ;;  %v599_v14 = vpop.f32.mrf.mxu3 }
 0x164   :  { %2001 = vmatpush.msra.mxu0 %v5291_v28  ;;  %2040 = vmatpush.msra.mxu1 %v5241_v33  ;;  %v5296_v33 = vld [vmem:[#allocation101_spill] sm:$0xff] }
 0x165   :  { %2093 = vmatpush.msra.mxu2 %v5292_v3  ;;  %2150 = vmatpush.msra.mxu3 %v5244_v23  ;;  %v5305_v28 = vld [vmem:[#allocation125_spill] sm:$0xff] }
 0x166   :  { %1835 = vmatmul.f32.vlgmr.msrb.gmra.mxu1 %v4294_v9  ;;  %2004 = vmatpush.msra.mxu0 %v5293_v41  ;;  %v5297_v9 = vld [vmem:[#allocation107_spill] sm:$0xff]  ;;  %v653_v30 = vpop.f32.mrf.mxu0  ;;  %v5306_v3 = vld [vmem:[#allocation121_spill] sm:$0xff]  ;;  %v5307_v41 = vld [vmem:[#allocation128_spill] sm:$0xff] }
 0x167   :  { %2042 = vmatpush.msra.mxu1 %v5244_v23  ;;  %2097 = vmatpush.msra.mxu2 %v5294_v44  ;;  %v5298_v23 = vld [vmem:[#allocation105_spill] sm:$0xff]  ;;  %v5309_v44 = vld [vmem:[#allocation131_spill] sm:$0xff] }
 0x168   :  { %2152 = vmatpush.msra.mxu3 %v5247_v62  ;;  %2007 = vmatpush.msra.mxu0 %v5295_v52  ;;  %v5310_v52 = vld [vmem:[#allocation130_spill] sm:$0xff] }
 0x169   :  { %2044 = vmatpush.msra.mxu1 %v5247_v62  ;;  %2101 = vmatpush.msra.mxu2 %v5296_v33  ;;  %v499_v62 = vadd.f32 %v498_v31, %v458_v42  ;;  %v5311_v33 = vld [vmem:[#allocation139_spill] sm:$0xff] }
 0x16a   :  { %2154 = vmatpush.msra.mxu3 %v5250_v56  ;;  %2010 = vmatpush.msra.mxu0 %v5297_v9  ;;  %v5314_v31 = vld [vmem:[#allocation135_spill] sm:$0xff] }
 0x16b   :  { %2046 = vmatpush.msra.mxu1 %v5250_v56  ;;  %2105 = vmatpush.msra.mxu2 %v5298_v23  ;;  %v5302_v56 = vld [vmem:[#allocation114_spill] sm:$0xff]  ;;  %v600_v11 = vadd.f32 %v599_v14, %v499_v62  ;;  %v798_v9 = vpop.f32.mrf.mxu3  ;;  %v5317_v62 = vld [vmem:[#allocation143_spill] sm:$0xff]  ;;  %v5318_v14 = vld [vmem:[#allocation144_spill] sm:$0xff] }
 0x16c   :  { %2156 = vmatpush.msra.mxu3 %v5253_v59  ;;  %2013 = vmatpush.msra.mxu0 %v5299_v32  ;;  %v5316_v32 = vld [vmem:[#allocation142_spill] sm:$0xff] }
 0x16d   :  { %2048 = vmatpush.msra.mxu1 %v5253_v59  ;;  %2109 = vmatpush.msra.mxu2 %v5300_v8  ;;  %v5304_v59 = vld [vmem:[#allocation117_spill] sm:$0xff]  ;;  %v654_v36 = vadd.f32 %v653_v30, %v600_v11 }
 0x16e   :  { %2158 = vmatpush.msra.mxu3 %v5256_v4  ;;  %2016 = vmatpush.msra.mxu0 %v5301_v63  ;;  %v839_v23 = vpop.f32.mrf.mxu0  ;;  %v5322_v11 = vld [vmem:[#allocation149_spill] sm:$0xff] }
 0x16f   :  { %2050 = vmatpush.msra.mxu1 %v5256_v4  ;;  %2113 = vmatpush.msra.mxu2 %v5302_v56  ;;  %v692_v4 = vpop.f32.mrf.mxu1  ;;  %v5319_v56 = vld [vmem:[#allocation145_spill] sm:$0xff] }
 0x170   :  { %2160 = vmatpush.msra.mxu3 %v5259_v19  ;;  %2019 = vmatpush.msra.mxu0 %v5303_v29  ;;  %v693_v50 = vadd.f32 %v692_v4, %v654_v36  ;;  %v5326_v36 = vld [vmem:[#allocation152_spill] sm:$0xff] }
 0x171   :  { %2052 = vmatpush.msra.mxu1 %v5259_v19  ;;  %2117 = vmatpush.msra.mxu2 %v5304_v59  ;;  %v5308_v19 = vld [vmem:[#allocation124_spill] sm:$0xff]  ;;  %v5321_v59 = vld [vmem:[#allocation155_spill] sm:$0xff] }
 0x172   :  { %2162 = vmatpush.msra.mxu3 %v5262_v0  ;;  %2022 = vmatpush.msra.mxu0 %v5305_v28  ;;  %v5323_v28 = vld [vmem:[#allocation158_spill] sm:$0xff] }
 0x173   :  { %2054 = vmatpush.msra.mxu1 %v5262_v0  ;;  %2121 = vmatpush.msra.mxu2 %v5306_v3  ;;  %v761_v0 = vpop.f32.mrf.mxu2  ;;  %v1033_v4 = vpop.f32.mrf.mxu3  ;;  %v5325_v3 = vld [vmem:[#allocation160_spill] sm:$0xff] }
 0x174   :  { %2164 = vmatpush.msra.mxu3 %v5265_v12  ;;  %2025 = vmatpush.msra.mxu0 %v5307_v41  ;;  %v762_v42 = vadd.f32 %v761_v0, %v693_v50 }
 0x175   :  { %2056 = vmatpush.msra.mxu1 %v5265_v12  ;;  %2125 = vmatpush.msra.mxu2 %v5308_v19  ;;  %v5312_v12 = vld [vmem:[#allocation133_spill] sm:$0xff]  ;;  %v5327_v19 = vld [vmem:[#allocation163_spill] sm:$0xff] }
 0x176   :  { %2166 = vmatpush.msra.mxu3 %v5268_v2  ;;  %2028 = vmatpush.msra.mxu0 %v5309_v44  ;;  %v799_v8 = vadd.f32 %v798_v9, %v762_v42  ;;  %v1102_v41 = vpop.f32.mrf.mxu0  ;;  %v5328_v44 = vld [vmem:[#allocation156_spill] sm:$0xff]  ;;  %v5330_v9 = vld [vmem:[#allocation159_spill] sm:$0xff] }
 0x177   :  { %2058 = vmatpush.msra.mxu1 %v5268_v2  ;;  %2129 = vmatpush.msra.mxu2 %v5310_v52  ;;  %v5313_v2 = vld [vmem:[#allocation140_spill] sm:$0xff] }
 0x178   :  { %2168 = vmatpush.msra.mxu3 %v5271_v16  ;;  %2031 = vmatmul.f32.vlgmr.msra.gmra.mxu0 %v4332_v10  ;;  %v840_v63 = vadd.f32 %v839_v23, %v799_v8  ;;  %v5324_v10 = vld [vmem:[#allocation150_spill] sm:$0xff] }
 0x179   :  { %2060 = vmatpush.msra.mxu1 %v5271_v16  ;;  %2181 = vmatpush.msrb.mxu0 %v5311_v33  ;;  %v5315_v16 = vld [vmem:[#allocation141_spill] sm:$0xff] }
 0x17a   :  { %2133 = vmatpush.msra.mxu2 %v5312_v12  ;;  %2170 = vmatpush.msra.mxu3 %v5274_v18  ;;  %v5329_v12 = vld [vmem:[#allocation166_spill] sm:$0xff] }
 0x17b   :  { %2062 = vmatpush.msra.mxu1 %v5274_v18  ;;  %2183 = vmatpush.msrb.mxu0 %v5313_v2  ;;  %v940_v18 = vpop.f32.mrf.mxu1  ;;  %v994_v30 = vpop.f32.mrf.mxu2 }
 0x17c   :  { %2137 = vmatpush.msra.mxu2 %v5314_v31  ;;  %2172 = vmatpush.msra.mxu3 %v5277_v1  ;;  %v941_v29 = vadd.f32 %v940_v18, %v840_v63  ;;  %v5331_v31 = vld [vmem:[#allocation169_spill] sm:$0xff]  ;;  %v5333_v63 = vld [vmem:[#allocation172_spill] sm:$0xff] }
 0x17d   :  { %2139 = vmatmul.f32.vlgmr.msra.gmra.mxu2 %v4321_v27  ;;  %2185 = vmatpush.msrb.mxu0 %v5315_v16 }
 0x17e   :  { %2324 = vmatpush.msrb.mxu2 %v5316_v32  ;;  %2064 = vmatpush.msra.mxu1 %v5277_v1  ;;  %v5320_v1 = vld [vmem:[#allocation147_spill] sm:$0xff]  ;;  %v5332_v32 = vld [vmem:[#allocation162_spill] sm:$0xff] }
 0x17f   :  { %2174 = vmatpush.msra.mxu3 %v5280_v37  ;;  %2187 = vmatpush.msrb.mxu0 %v5317_v62 }
 0x180   :  { %2176 = vmatmul.f32.vlgmr.msra.gmra.mxu3 %v4321_v27  ;;  %2327 = vmatpush.msrb.mxu2 %v5318_v14  ;;  %v1492_v27 = vld.sshfl [vmem:[#allocation1 + $0x10] sm:$0xff pattern:$0x73625140] }
 0x181   :  { %2377 = vmatpush.msrb.mxu3 %v5311_v33  ;;  %2066 = vmatpush.msra.mxu1 %v5280_v37  ;;  %v995_v37 = vadd.f32 %v994_v30, %v941_v29  ;;  %v5334_v14 = vld [vmem:[#allocation165_spill] sm:$0xff]  ;;  %v5335_v29 = vld [vmem:[#allocation175_spill] sm:$0xff]  ;;  %v5336_v30 = vld [vmem:[#allocation168_spill] sm:$0xff] }
 0x182   :  { %2189 = vmatpush.msrb.mxu0 %v5319_v56  ;;  %2070 = vmatmul.f32.vlgmr.msra.gmra.mxu1 %v1873_v57  ;;  %v4443_v57 = vand.u32 4294901760, %v1492_v27 }
 0x183   :  { %2330 = vmatpush.msrb.mxu2 %v5320_v1  ;;  %2226 = vmatpush.msrb.mxu1 %v5321_v59  ;;  %v1034_v50 = vadd.f32 %v1033_v4, %v995_v37  ;;  %v1139_v52 = vpop.f32.mrf.mxu1  ;;  %v1180_v18 = vpop.f32.mrf.mxu2  ;;  %v5339_v37 = vld [vmem:[#allocation183_spill] sm:$0xff] }
 0x184   :  { %2379 = vmatpush.msrb.mxu3 %v5313_v2  ;;  %2191 = vmatpush.msrb.mxu0 %v3613_v24  ;;  %v4454_v0 = vsub.f32 %v1492_v27, %v4443_v57  ;;  %v1281_v27 = vpop.f32.mrf.mxu3 }
 0x185   :  { %2333 = vmatpush.msrb.mxu2 %v5322_v11  ;;  %2232 = vmatpush.msrb.mxu1 %v5323_v28  ;;  %v1103_v42 = vadd.f32 %v1102_v41, %v1034_v50  ;;  %v5337_v11 = vld [vmem:[#allocation179_spill] sm:$0xff]  ;;  %v5341_v41 = vld [vmem:[#allocation186_spill] sm:$0xff] }
 0x186   :  { %2381 = vmatpush.msrb.mxu3 %v5315_v16  ;;  %2193 = vmatpush.msrb.mxu0 %v3632_v54  ;;  %v2214_v8 = vand.u32 4294901760, %v4454_v0  ;;  %v5338_v28 = vld [vmem:[#allocation171_spill] sm:$0xff] }
 0x187   :  { %2336 = vmatpush.msrb.mxu2 %v5324_v10  ;;  %2238 = vmatpush.msrb.mxu1 %v5325_v3  ;;  %v1140_v23 = vadd.f32 %v1139_v52, %v1103_v42  ;;  %v5340_v3 = vld [vmem:[#allocation174_spill] sm:$0xff] }
 0x188   :  { %2383 = vmatpush.msrb.mxu3 %v5317_v62  ;;  %2195 = vmatpush.msrb.mxu0 %v3646_v47  ;;  %v2215_v59 = vsub.f32 %v4454_v0, %v2214_v8  ;;  %v5344_v42 = vld [vmem:[#allocation182_spill] sm:$0xff] }
 0x189   :  { %2339 = vmatpush.msrb.mxu2 %v5326_v36  ;;  %2244 = vmatpush.msrb.mxu1 %v5327_v19  ;;  %v1181_v1 = vadd.f32 %v1180_v18, %v1140_v23  ;;  %v5342_v19 = vld [vmem:[#allocation177_spill] sm:$0xff]  ;;  %v5346_v23 = vld [vmem:[#allocation192_spill] sm:$0xff] }
 0x18a   :  { %2385 = vmatpush.msrb.mxu3 %v5319_v56  ;;  %2197 = vmatpush.msrb.mxu0 %v3662_v20  ;;  %v2216_v36 = vand.u32 4294901760, %v2215_v59  ;;  %v5351_v59 = vld [vmem:[#allocation199_spill] sm:$0xff] }
 0x18b   :  { %2342 = vmatpush.msrb.mxu2 %v5328_v44  ;;  %2250 = vmatpush.msrb.mxu1 %v5329_v12  ;;  %v1282_v4 = vadd.f32 %v1281_v27, %v1181_v1  ;;  %v5343_v44 = vld [vmem:[#allocation189_spill] sm:$0xff] }
 0x18c   :  { %2387 = vmatpush.msrb.mxu3 %v3613_v24  ;;  %2199 = vmatpush.msrb.mxu0 %v3678_v40  ;;  %v5352_v27 = vld [vmem:[#allocation153_spill] sm:$0xff] }
 0x18d   :  { %2345 = vmatpush.msrb.mxu2 %v5330_v9  ;;  %2256 = vmatpush.msrb.mxu1 %v5331_v31  ;;  %v5345_v31 = vld [vmem:[#allocation146_spill] sm:$0xff] }
 0x18e   :  { %2389 = vmatpush.msrb.mxu3 %v3632_v54  ;;  %2201 = vmatpush.msrb.mxu0 %v3692_v43  ;;  %v1335_v10 = vpop.f32.mrf.mxu0 }
 0x18f   :  { %2348 = vmatpush.msrb.mxu2 %v5332_v32  ;;  %2262 = vmatpush.msrb.mxu1 %v5333_v63  ;;  %v1336_v50 = vadd.f32 %v1335_v10, %v1282_v4  ;;  %v5347_v32 = vld [vmem:[#allocation187_spill] sm:$0xff]  ;;  %v5357_v10 = vld [vmem:[#allocation157_spill] sm:$0xff] }
 0x190   :  { %2391 = vmatpush.msrb.mxu3 %v3646_v47  ;;  %2203 = vmatpush.msrb.mxu0 %v3708_v55  ;;  %v5359_v4 = vld [vmem:[#allocation161_spill] sm:$0xff] }
 0x191   :  { %2351 = vmatpush.msrb.mxu2 %v5334_v14  ;;  %2268 = vmatpush.msrb.mxu1 %v5335_v29  ;;  %v5348_v14 = vld [vmem:[#allocation148_spill] sm:$0xff]  ;;  %v5349_v29 = vld [vmem:[#allocation195_spill] sm:$0xff] }
 0x192   :  { %2393 = vmatpush.msrb.mxu3 %v3662_v20  ;;  %2205 = vmatpush.msrb.mxu0 %v3726_v21 }
 0x193   :  { %2354 = vmatpush.msrb.mxu2 %v5336_v30  ;;  %2274 = vmatpush.msrb.mxu1 %v5337_v11  ;;  %v5350_v30 = vld [vmem:[#allocation151_spill] sm:$0xff]  ;;  %v5353_v11 = vld [vmem:[#allocation202_spill] sm:$0xff] }
 0x194   :  { %2395 = vmatpush.msrb.mxu3 %v3678_v40  ;;  %2207 = vmatpush.msrb.mxu0 %v3742_v34 }
 0x195   :  { %2357 = vmatpush.msrb.mxu2 %v5338_v28  ;;  %2280 = vmatpush.msrb.mxu1 %v5339_v37  ;;  %v5354_v28 = vld [vmem:[#allocation204_spill] sm:$0xff]  ;;  %v5356_v37 = vld [vmem:[#allocation206_spill] sm:$0xff] }
 0x196   :  { %2397 = vmatpush.msrb.mxu3 %v3692_v43  ;;  %2209 = vmatpush.msrb.mxu0 %v3769_v45 }
 0x197   :  { %2360 = vmatpush.msrb.mxu2 %v5340_v3  ;;  %2286 = vmatpush.msrb.mxu1 %v5341_v41  ;;  %v5360_v3 = vld [vmem:[#allocation212_spill] sm:$0xff]  ;;  %v5362_v41 = vld [vmem:[#allocation215_spill] sm:$0xff] }
 0x198   :  { %2399 = vmatpush.msrb.mxu3 %v3708_v55  ;;  %2211 = vmatpush.msrb.mxu0 %v5177_v26 }
 0x199   :  { %2363 = vmatpush.msrb.mxu2 %v5342_v19  ;;  %2292 = vmatpush.msrb.mxu1 %v5343_v44  ;;  %v1374_v52 = vpop.f32.mrf.mxu1  ;;  %v5366_v44 = vld [vmem:[#allocation221_spill] sm:$0xff] }
 0x19a   :  { %2401 = vmatpush.msrb.mxu3 %v3726_v21  ;;  %v1443_v12 = vpop.f32.mrf.mxu2  ;;  %2217 = vmatmul.f32.vlgmr.msrb.gmra.mxu0 %v2216_v36  ;;  %v1375_v9 = vadd.f32 %v1374_v52, %v1336_v50  ;;  %v1493_v36 = vld.sshfl [vmem:[#allocation1 + $0x18] sm:$0xff pattern:$0x73625140] }
 0x19b   :  { %2366 = vmatpush.msrb.mxu2 %v5344_v42  ;;  %2418 = vmatpush.msra.mxu0 %v5345_v31  ;;  %v4524_v19 = vand.u32 4294901760, %v1493_v36  ;;  %v5365_v50 = vld [vmem:[#allocation170_spill] sm:$0xff]  ;;  %v5377_v31 = vld [vmem:[#allocation227_spill] sm:$0xff] }
 0x19c   :  { %2298 = vmatpush.msrb.mxu1 %v5346_v23  ;;  %2403 = vmatpush.msrb.mxu3 %v3742_v34  ;;  %v1444_v18 = vadd.f32 %v1443_v12, %v1375_v9  ;;  %v5369_v12 = vld [vmem:[#allocation176_spill] sm:$0xff]  ;;  %v5371_v9 = vld [vmem:[#allocation230_spill] sm:$0xff]  ;;  %v5381_v23 = vld [vmem:[#allocation191_spill] sm:$0xff] }
 0x19d   :  { %2369 = vmatpush.msrb.mxu2 %v5347_v32  ;;  %v1480_v63 = vpop.f32.mrf.mxu3  ;;  %2422 = vmatpush.msra.mxu0 %v5348_v14  ;;  %v4535_v52 = vsub.f32 %v1493_v36, %v4524_v19  ;;  %v5382_v32 = vld [vmem:[#allocation238_spill] sm:$0xff]  ;;  %v5388_v14 = vld [vmem:[#allocation200_spill] sm:$0xff] }
 0x19e   :  { %2304 = vmatpush.msrb.mxu1 %v5349_v29  ;;  %2405 = vmatpush.msrb.mxu3 %v3769_v45  ;;  %v1481_v1 = vadd.f32 %v1480_v63, %v1444_v18  ;;  %v5384_v18 = vld [vmem:[#allocation196_spill] sm:$0xff]  ;;  %v5386_v63 = vld [vmem:[#allocation198_spill] sm:$0xff]  ;;  %v5389_v29 = vld [vmem:[#allocation205_spill] sm:$0xff] }
 0x19f   :  { %2372 = vmatmul.f32.vlgmr.msrb.gmra.mxu2 %v4454_v0  ;;  %2426 = vmatpush.msra.mxu0 %v5350_v30  ;;  %v5355_v0 = vld [vmem:[#allocation154_spill] sm:$0xff]  ;;  %v2555_v42 = vand.u32 4294901760, %v4535_v52 }
 0x1a0   :  { %2522 = vmatpush.msra.mxu2 %v5176_v53  ;;  %2310 = vmatpush.msrb.mxu1 %v5351_v59  ;;  %1483 = vst [vmem:[#allocation7] sm:$0x3] %v1481_v1  ;;  %v5393_v1 = vld [vmem:[#allocation211_spill] sm:$0xff]  ;;  %v5395_v30 = vld [vmem:[#allocation214_spill] sm:$0xff]  ;;  %v5397_v59 = vld [vmem:[#allocation217_spill] sm:$0xff] }
 0x1a1   :  { %2407 = vmatpush.msrb.mxu3 %v5177_v26  ;;  %2430 = vmatpush.msra.mxu0 %v5352_v27  ;;  %v5399_v27 = vld [vmem:[#allocation220_spill] sm:$0xff] }
 0x1a2   :  { %2411 = vmatmul.f32.vlgmr.msrb.gmra.mxu3 %v2214_v8  ;;  %2524 = vmatpush.msra.mxu2 %v3813_v48  ;;  %v5358_v8 = vld [vmem:[#allocation209_spill] sm:$0xff] }
 0x1a3   :  { %2567 = vmatpush.msra.mxu3 %v5353_v11  ;;  %2316 = vmatpush.msrb.mxu1 %v5354_v28  ;;  %v5401_v11 = vld [vmem:[#allocation223_spill] sm:$0xff]  ;;  %v5403_v28 = vld [vmem:[#allocation226_spill] sm:$0xff] }
 0x1a4   :  { %2434 = vmatpush.msra.mxu0 %v5355_v0  ;;  %2318 = vmatmul.f32.vlgmr.msrb.gmra.mxu1 %v4443_v57  ;;  %v5405_v0 = vld [vmem:[#allocation229_spill] sm:$0xff] }
 0x1a5   :  { %2526 = vmatpush.msra.mxu2 %v3832_v13  ;;  %2485 = vmatpush.msra.mxu1 %v5311_v33  ;;  %v5361_v33 = vld [vmem:[#allocation164_spill] sm:$0xff] }
 0x1a6   :  { %2573 = vmatpush.msra.mxu3 %v5356_v37  ;;  %2438 = vmatpush.msra.mxu0 %v5357_v10  ;;  %v5407_v37 = vld [vmem:[#allocation232_spill] sm:$0xff]  ;;  %v5410_v10 = vld [vmem:[#allocation235_spill] sm:$0xff] }
 0x1a7   :  { %2528 = vmatpush.msra.mxu2 %v3839_v7  ;;  %2487 = vmatpush.msra.mxu1 %v5313_v2  ;;  %v5363_v2 = vld [vmem:[#allocation167_spill] sm:$0xff] }
 0x1a8   :  { %2579 = vmatpush.msra.mxu3 %v5358_v8  ;;  %2442 = vmatpush.msra.mxu0 %v5359_v4 }
 0x1a9   :  { %2530 = vmatpush.msra.mxu2 %v3855_v5  ;;  %2489 = vmatpush.msra.mxu1 %v5315_v16  ;;  %v5364_v16 = vld [vmem:[#allocation218_spill] sm:$0xff] }
 0x1aa   :  { %2585 = vmatpush.msra.mxu3 %v5360_v3  ;;  %2446 = vmatpush.msra.mxu0 %v5361_v33 }
 0x1ab   :  { %2532 = vmatpush.msra.mxu2 %v3881_v58  ;;  %2491 = vmatpush.msra.mxu1 %v5317_v62  ;;  %v5367_v62 = vld [vmem:[#allocation173_spill] sm:$0xff] }
 0x1ac   :  { %2591 = vmatpush.msra.mxu3 %v5362_v41  ;;  %2450 = vmatpush.msra.mxu0 %v5363_v2 }
 0x1ad   :  { %2534 = vmatpush.msra.mxu2 %v3896_v17  ;;  %2493 = vmatpush.msra.mxu1 %v5319_v56  ;;  %v5368_v56 = vld [vmem:[#allocation224_spill] sm:$0xff] }
 0x1ae   :  { %2597 = vmatpush.msra.mxu3 %v5364_v16  ;;  %2454 = vmatpush.msra.mxu0 %v5365_v50 }
 0x1af   :  { %2536 = vmatpush.msra.mxu2 %v3912_v35  ;;  %2495 = vmatpush.msra.mxu1 %v3613_v24  ;;  %v5370_v24 = vld [vmem:[#allocation181_spill] sm:$0xff] }
 0x1b0   :  { %2603 = vmatpush.msra.mxu3 %v5366_v44  ;;  %2458 = vmatpush.msra.mxu0 %v5367_v62 }
 0x1b1   :  { %2538 = vmatpush.msra.mxu2 %v3930_v25  ;;  %2497 = vmatpush.msra.mxu1 %v3632_v54  ;;  %v5372_v54 = vld [vmem:[#allocation184_spill] sm:$0xff] }
 0x1b2   :  { %2609 = vmatpush.msra.mxu3 %v5368_v56  ;;  %2462 = vmatpush.msra.mxu0 %v5369_v12 }
 0x1b3   :  { %2540 = vmatpush.msra.mxu2 %v3949_v38  ;;  %2499 = vmatpush.msra.mxu1 %v3646_v47  ;;  %v5373_v47 = vld [vmem:[#allocation188_spill] sm:$0xff] }
 0x1b4   :  { %2615 = vmatpush.msra.mxu3 %v4054_v46  ;;  %2466 = vmatpush.msra.mxu0 %v5370_v24  ;;  %v2556_v46 = vsub.f32 %v4535_v52, %v2555_v42 }
 0x1b5   :  { %2542 = vmatpush.msra.mxu2 %v3965_v60  ;;  %2501 = vmatpush.msra.mxu1 %v3662_v20  ;;  %v5374_v20 = vld [vmem:[#allocation234_spill] sm:$0xff] }
 0x1b6   :  { %2621 = vmatpush.msra.mxu3 %v5371_v9  ;;  %2470 = vmatpush.msra.mxu0 %v5372_v54 }
 0x1b7   :  { %2544 = vmatpush.msra.mxu2 %v3981_v61  ;;  %2503 = vmatpush.msra.mxu1 %v3678_v40  ;;  %v2557_v40 = vand.u32 4294901760, %v2556_v46 }
 0x1b8   :  { %2627 = vmatpush.msra.mxu3 %v4086_v6  ;;  %2474 = vmatpush.msra.mxu0 %v5373_v47  ;;  %v5375_v6 = vld [vmem:[#allocation185_spill] sm:$0xff] }
 0x1b9   :  { %2546 = vmatpush.msra.mxu2 %v3997_v15  ;;  %2505 = vmatpush.msra.mxu1 %v3692_v43  ;;  %v5376_v43 = vld [vmem:[#allocation236_spill] sm:$0xff] }
 0x1ba   :  { %2633 = vmatpush.msra.mxu3 %v5374_v20  ;;  %2478 = vmatpush.msra.mxu0 %v3862_v22  ;;  %v5378_v22 = vld [vmem:[#allocation190_spill] sm:$0xff]  ;;  %v2976_v20 = vmov 0.0  }
 0x1bb   :  { %2548 = vmatpush.msra.mxu2 %v4015_v49  ;;  %2507 = vmatpush.msra.mxu1 %v3708_v55  ;;  %v5379_v55 = vld [vmem:[#allocation237_spill] sm:$0xff]  ;;  %1485 = vst [vmem:[#allocation7 + $0x2] sm:$0x3] %v2976_v20 }
 0x1bc   :  { %2639 = vmatpush.msra.mxu3 %v4109_v51  ;;  %2480 = vmatmul.f32.vlgmr.msra.gmra.mxu0 %v4443_v57  ;;  %v5380_v51 = vld [vmem:[#allocation193_spill] sm:$0xff]  ;;  %2865 = vst [vmem:[#allocation7 + $0x6] sm:$0x3] %v2976_v20 }
 0x1bd   :  { %2550 = vmatpush.msra.mxu2 %v4031_v39  ;;  %2665 = vmatpush.msrb.mxu0 %v5375_v6 }
 0x1be   :  { %2509 = vmatpush.msra.mxu1 %v3726_v21  ;;  %2645 = vmatpush.msra.mxu3 %v5376_v43  ;;  %v5383_v21 = vld [vmem:[#allocation194_spill] sm:$0xff] }
 0x1bf   :  { %2552 = vmatpush.msra.mxu2 %v5377_v31  ;;  %2668 = vmatpush.msrb.mxu0 %v5378_v22 }
 0x1c0   :  { %2511 = vmatpush.msra.mxu1 %v3742_v34  ;;  %2651 = vmatpush.msra.mxu3 %v5379_v55  ;;  %v5385_v34 = vld [vmem:[#allocation197_spill] sm:$0xff] }
 0x1c1   :  { %2558 = vmatmul.f32.vlgmr.msra.gmra.mxu2 %v2557_v40  ;;  %2671 = vmatpush.msrb.mxu0 %v5380_v51 }
 0x1c2   :  { %2759 = vmatpush.msrb.mxu2 %v5381_v23  ;;  %2513 = vmatpush.msra.mxu1 %v3769_v45  ;;  %v5387_v45 = vld [vmem:[#allocation201_spill] sm:$0xff] }
 0x1c3   :  { %2657 = vmatpush.msra.mxu3 %v5382_v32  ;;  %2674 = vmatpush.msrb.mxu0 %v5383_v21 }
 0x1c4   :  { %2659 = vmatmul.f32.vlgmr.msra.gmra.mxu3 %v4524_v19  ;;  %2763 = vmatpush.msrb.mxu2 %v5384_v18 }
 0x1c5   :  { %2826 = vmatpush.msrb.mxu3 %v5176_v53  ;;  %2515 = vmatpush.msra.mxu1 %v5177_v26  ;;  %v5390_v26 = vld [vmem:[#allocation203_spill] sm:$0xff] }
 0x1c6   :  { %2677 = vmatpush.msrb.mxu0 %v5385_v34  ;;  %2517 = vmatmul.f32.vlgmr.msra.gmra.mxu1 %v4443_v57  ;;  %v5391_v57 = vld [vmem:[#allocation208_spill] sm:$0xff] }
 0x1c7   :  { %2767 = vmatpush.msrb.mxu2 %v5386_v63  ;;  %2718 = vmatpush.msrb.mxu1 %v5176_v53  ;;  %v5392_v53 = vld [vmem:[#allocation207_spill] sm:$0xff] }
 0x1c8   :  { %2828 = vmatpush.msrb.mxu3 %v3813_v48  ;;  %2680 = vmatpush.msrb.mxu0 %v5387_v45 }
 0x1c9   :  { %2771 = vmatpush.msrb.mxu2 %v5388_v14  ;;  %2720 = vmatpush.msrb.mxu1 %v3813_v48  ;;  %v5394_v48 = vld [vmem:[#allocation210_spill] sm:$0xff] }
 0x1ca   :  { %2830 = vmatpush.msrb.mxu3 %v3832_v13  ;;  %2683 = vmatpush.msrb.mxu0 %v5389_v29 }
 0x1cb   :  { %2775 = vmatpush.msrb.mxu2 %v5390_v26  ;;  %2722 = vmatpush.msrb.mxu1 %v3832_v13  ;;  %v5396_v13 = vld [vmem:[#allocation213_spill] sm:$0xff] }
 0x1cc   :  { %2832 = vmatpush.msrb.mxu3 %v3839_v7  ;;  %2686 = vmatpush.msrb.mxu0 %v5391_v57 }
 0x1cd   :  { %2779 = vmatpush.msrb.mxu2 %v5392_v53  ;;  %2724 = vmatpush.msrb.mxu1 %v3839_v7  ;;  %v5398_v7 = vld [vmem:[#allocation216_spill] sm:$0xff] }
 0x1ce   :  { %2834 = vmatpush.msrb.mxu3 %v3855_v5  ;;  %2689 = vmatpush.msrb.mxu0 %v5393_v1 }
 0x1cf   :  { %2783 = vmatpush.msrb.mxu2 %v5394_v48  ;;  %2726 = vmatpush.msrb.mxu1 %v3855_v5  ;;  %v5400_v5 = vld [vmem:[#allocation219_spill] sm:$0xff] }
 0x1d0   :  { %2836 = vmatpush.msrb.mxu3 %v3881_v58  ;;  %2692 = vmatpush.msrb.mxu0 %v5395_v30 }
 0x1d1   :  { %2787 = vmatpush.msrb.mxu2 %v5396_v13  ;;  %2728 = vmatpush.msrb.mxu1 %v3881_v58  ;;  %v5402_v58 = vld [vmem:[#allocation222_spill] sm:$0xff] }
 0x1d2   :  { %2838 = vmatpush.msrb.mxu3 %v3896_v17  ;;  %2695 = vmatpush.msrb.mxu0 %v5397_v59 }
 0x1d3   :  { %2791 = vmatpush.msrb.mxu2 %v5398_v7  ;;  %2730 = vmatpush.msrb.mxu1 %v3896_v17  ;;  %v5404_v17 = vld [vmem:[#allocation225_spill] sm:$0xff] }
 0x1d4   :  { %2840 = vmatpush.msrb.mxu3 %v3912_v35  ;;  %2698 = vmatpush.msrb.mxu0 %v5399_v27 }
 0x1d5   :  { %2795 = vmatpush.msrb.mxu2 %v5400_v5  ;;  %2732 = vmatpush.msrb.mxu1 %v3912_v35  ;;  %v5406_v35 = vld [vmem:[#allocation228_spill] sm:$0xff] }
 0x1d6   :  { %2842 = vmatpush.msrb.mxu3 %v3930_v25  ;;  %2701 = vmatpush.msrb.mxu0 %v5401_v11 }
 0x1d7   :  { %2799 = vmatpush.msrb.mxu2 %v5402_v58  ;;  %2734 = vmatpush.msrb.mxu1 %v3930_v25  ;;  %v5408_v25 = vld [vmem:[#allocation231_spill] sm:$0xff] }
 0x1d8   :  { %2844 = vmatpush.msrb.mxu3 %v3949_v38  ;;  %2704 = vmatpush.msrb.mxu0 %v5403_v28 }
 0x1d9   :  { %2803 = vmatpush.msrb.mxu2 %v5404_v17  ;;  %2736 = vmatpush.msrb.mxu1 %v3949_v38  ;;  %v5409_v38 = vld [vmem:[#allocation233_spill] sm:$0xff] }
 0x1da   :  { %2846 = vmatpush.msrb.mxu3 %v3965_v60  ;;  %2707 = vmatpush.msrb.mxu0 %v5405_v0  ;;  %v1691_v8 = vpop.f32.mrf.mxu2 }
 0x1db   :  { %2807 = vmatpush.msrb.mxu2 %v5406_v35  ;;  %2738 = vmatpush.msrb.mxu1 %v3965_v60 }
 0x1dc   :  { %2848 = vmatpush.msrb.mxu3 %v3981_v61  ;;  %2710 = vmatpush.msrb.mxu0 %v5407_v37 }
 0x1dd   :  { %2811 = vmatpush.msrb.mxu2 %v5408_v25  ;;  %2740 = vmatpush.msrb.mxu1 %v3981_v61  ;;  %v1536_v61 = vpop.f32.mrf.mxu0  ;;  %v1730_v4 = vpop.f32.mrf.mxu3 }
 0x1de   :  { %2850 = vmatpush.msrb.mxu3 %v3997_v15  ;;  %2713 = vmatmul.f32.vlgmr.msrb.gmra.mxu0 %v4535_v52 }
 0x1df   :  { %2815 = vmatpush.msrb.mxu2 %v5409_v38  ;;  %2742 = vmatpush.msrb.mxu1 %v3997_v15  ;;  %v1637_v15 = vpop.f32.mrf.mxu1 }
 0x1e0   :  { %2852 = vmatpush.msrb.mxu3 %v4015_v49  ;;  %v1638_v60 = vadd.f32 %v1637_v15, %v1536_v61 }
 0x1e1   :  { %2819 = vmatpush.msrb.mxu2 %v5410_v10  ;;  %2744 = vmatpush.msrb.mxu1 %v4015_v49 }
 0x1e2   :  { %2854 = vmatpush.msrb.mxu3 %v4031_v39  ;;  %2821 = vmatmul.f32.vlgmr.msrb.gmra.mxu2 %v4524_v19  ;;  %v1692_v49 = vadd.f32 %v1691_v8, %v1638_v60 }
 0x1e3   :  { %2746 = vmatpush.msrb.mxu1 %v4031_v39  ;;  %v1877_v2 = vpop.f32.mrf.mxu2 }
 0x1e4   :  { %2856 = vmatpush.msrb.mxu3 %v5377_v31  ;;  %v1731_v3 = vadd.f32 %v1730_v4, %v1692_v49 }
 0x1e5   :  { %2858 = vmatmul.f32.vlgmr.msrb.gmra.mxu3 %v4524_v19  ;;  %2748 = vmatpush.msrb.mxu1 %v5377_v31  ;;  %v1799_v36 = vpop.f32.mrf.mxu0 }
 0x1e6   :  { %2752 = vmatmul.f32.vlgmr.msrb.gmra.mxu1 %v2555_v42  ;;  %v1800_v33 = vadd.f32 %v1799_v36, %v1731_v3  ;;  %v1978_v50 = vpop.f32.mrf.mxu3 }
 0x1e7   :  { %v1836_v41 = vpop.f32.mrf.mxu1 }
 0x1e8   :  { %v1837_v39 = vadd.f32 %v1836_v41, %v1800_v33 }
 0x1ea   :  { %v1878_v16 = vadd.f32 %v1877_v2, %v1837_v39 }
 0x1ec   :  { %v1979_v44 = vadd.f32 %v1978_v50, %v1878_v16 }
 0x1f5   :  { %v2032_v19 = vpop.f32.mrf.mxu0 }
 0x1f6   :  { %v2033_v56 = vadd.f32 %v2032_v19, %v1979_v44 }
 0x1ff   :  { %v2071_v62 = vpop.f32.mrf.mxu1 }
 0x200   :  { %v2072_v52 = vadd.f32 %v2071_v62, %v2033_v56  ;;  %v2140_v12 = vpop.f32.mrf.mxu2 }
 0x202   :  { %v2141_v24 = vadd.f32 %v2140_v12, %v2072_v52 }
 0x203   :  { %v2177_v42 = vpop.f32.mrf.mxu3 }
 0x204   :  { %v2178_v54 = vadd.f32 %v2177_v42, %v2141_v24 }
 0x217   :  { %v2218_v9 = vpop.f32.mrf.mxu0 }
 0x218   :  { %v2219_v46 = vadd.f32 %v2218_v9, %v2178_v54 }
 0x221   :  { %v2319_v47 = vpop.f32.mrf.mxu1 }
 0x222   :  { %v2320_v40 = vadd.f32 %v2319_v47, %v2219_v46  ;;  %v2373_v6 = vpop.f32.mrf.mxu2 }
 0x224   :  { %v2374_v43 = vadd.f32 %v2373_v6, %v2320_v40 }
 0x225   :  { %v2412_v31 = vpop.f32.mrf.mxu3 }
 0x226   :  { %v2413_v55 = vadd.f32 %v2412_v31, %v2374_v43 }
 0x239   :  { %v2481_v22 = vpop.f32.mrf.mxu0 }
 0x23a   :  { %v2482_v23 = vadd.f32 %v2481_v22, %v2413_v55 }
 0x243   :  { %v2518_v51 = vpop.f32.mrf.mxu1 }
 0x244   :  { %v2519_v32 = vadd.f32 %v2518_v51, %v2482_v23  ;;  %v2559_v21 = vpop.f32.mrf.mxu2 }
 0x246   :  { %v2560_v18 = vadd.f32 %v2559_v21, %v2519_v32 }
 0x247   :  { %v2660_v34 = vpop.f32.mrf.mxu3 }
 0x248   :  { %v2661_v45 = vadd.f32 %v2660_v34, %v2560_v18 }
 0x25b   :  { %v2714_v63 = vpop.f32.mrf.mxu0 }
 0x25c   :  { %v2715_v14 = vadd.f32 %v2714_v63, %v2661_v45 }
 0x263   :  { %v2753_v29 = vpop.f32.mrf.mxu1 }
 0x264   :  { %v2754_v26 = vadd.f32 %v2753_v29, %v2715_v14 }
 0x265   :  { %v2822_v57 = vpop.f32.mrf.mxu2 }
 0x266   :  { %v2823_v53 = vadd.f32 %v2822_v57, %v2754_v26 }
 0x268   :  { %v2859_v1 = vpop.f32.mrf.mxu3 }
 0x269   :  { %v2860_v48 = vadd.f32 %v2859_v1, %v2823_v53 }
 0x26b   :  { %2863 = vst [vmem:[#allocation7 + $0x4] sm:$0x3] %v2860_v48 }
 0x26c   :  { %2878 = dma.vmem_to_hbm [thread:$0]  %s2871_s1, 128, %s2873_s23, [#allocation4], %s2978_s24, %s2978_s24, %s2979_s25  }
 0x26d   :  { %2970 = dma.done.wait [#allocation4], 128  }
 0x26e   :  { %2971 = vsyncadd [#allocation4], 4294967168 }
 0x26f   :  { %2883 = vsyncpa [#allocation3], 1 }
 0x270   :  { %2884 = vsyncpa [#allocation6], 1 }
 0x271   :  { %2885 = vsyncpa [#allocation4], 1 }

</bundles_post_ra>
